<compile_context>
chip_gen: v5e
topology: v5e:2x2
jax: 0.10.0
libtpu: 0.0.40
codegen_flags: <defaults>
</compile_context>

<pallas_src>
import functools

import jax
import jax.numpy as jnp
from jax.experimental import pallas as pl
from jax.experimental.pallas import tpu as pltpu


def _disc_loss_kernel(f_ref, loss_ref, tmp_ref, den_ref,
                      a01, a02, a12, a31, a32, *, total_b):
    # --- init accumulators on the first tile --------------------------------
    @pl.when(pl.program_id(0) == 0)
    def _init():
        for acc in (a01, a02, a12, a31, a32):
            acc[...] = jnp.zeros_like(acc)

    # --- per-tile work -------------------------------------------------------
    # In-kernel upcast (VPU filler, mem-bound kernel) avoids a wrapper-side
    # f32 HBM copy for bf16 inputs.
    f0 = f_ref[0].astype(jnp.float32)   # (TB, D)
    f1 = f_ref[1].astype(jnp.float32)
    f2 = f_ref[2].astype(jnp.float32)
    f3 = f_ref[3].astype(jnp.float32)

    # Hoisted per-row norms (each reused across multiple pairs).
    l0 = jnp.sqrt(jnp.sum(f0 * f0, axis=1, keepdims=True))   # (TB, 1)
    l1 = jnp.sqrt(jnp.sum(f1 * f1, axis=1, keepdims=True))
    l2 = jnp.sqrt(jnp.sum(f2 * f2, axis=1, keepdims=True))
    l3 = jnp.sqrt(jnp.sum(f3 * f3, axis=1, keepdims=True))

    def pair_partial(a, b, la, lb):
        # torch: 1 - <a,b> / (|a||b| + 1e-8), summed over the rows of this tile.
        ip = jnp.sum(a * b, axis=1, keepdims=True)               # (TB, 1)
        cos = ip * pl.reciprocal(la * lb + 1e-8, approx=False)   # exact divide
        return jnp.sum(1.0 - cos, axis=0, keepdims=True)         # (1, 1)

    a01[...] += pair_partial(f0, f1, l0, l1)
    a02[...] += pair_partial(f0, f2, l0, l2)
    a12[...] += pair_partial(f1, f2, l1, l2)
    a31[...] += pair_partial(f3, f1, l3, l1)
    a32[...] += pair_partial(f3, f2, l3, l2)

    # --- finalize on the last tile -------------------------------------------
    @pl.when(pl.program_id(0) == pl.num_programs(0) - 1)
    def _finalize():
        inv_b = 1.0 / float(total_b)                             # static constant
        tmp = (a01[...] + a02[...]) * inv_b                      # (1, 1)
        molecule = tmp + a12[...] * (0.01 * inv_b)
        denominator = (a31[...] + a32[...]) * inv_b + 1e-5
        loss = molecule * pl.reciprocal(denominator, approx=False) + tmp * 0.1
        loss_ref[...] = loss                                     # full-tile stores
        tmp_ref[...] = tmp
        den_ref[...] = denominator


def _pick_tile_b(B, D, itemsize):
    # Keep the double-buffered input block well under the scoped-VMEM limit on
    # every generation: 2 buffers * 4 features * TB * D * itemsize <= ~8 MiB.
    budget = 8 * 1024 * 1024
    max_tb = max(8, budget // (2 * 4 * D * itemsize))
    for tb in (1024, 512, 256, 128, 64, 32, 16, 8):
        if tb <= max_tb and B % tb == 0:
            return tb
    return B  # fall back to a single full-extent block (always legal)


def discriminator_loss(features, *, tile_b=None):
    """features: [4, B, D] (f32 or bf16). Returns (loss, tmp, denominator) f32 scalars."""
    assert features.ndim == 3 and features.shape[0] == 4
    _, B, D = features.shape
    itemsize = jnp.dtype(features.dtype).itemsize
    if (tile_b is None) or (B % tile_b != 0) or (tile_b % 8 != 0 and tile_b != B):
        tile_b = _pick_tile_b(B, D, itemsize)

    kernel = functools.partial(_disc_loss_kernel, total_b=B)
    scalar_out = jax.ShapeDtypeStruct((1, 1), jnp.float32)
    scalar_spec = pl.BlockSpec((1, 1), lambda i: (0, 0))
    loss, tmp, den = pl.pallas_call(
        kernel,
        out_shape=(scalar_out, scalar_out, scalar_out),
        grid=(B // tile_b,),
        in_specs=[pl.BlockSpec((4, tile_b, D), lambda i: (0, i, 0))],
        out_specs=(scalar_spec, scalar_spec, scalar_spec),
        scratch_shapes=[pltpu.VMEM((1, 1), jnp.float32)] * 5,
        compiler_params=pltpu.CompilerParams(
            dimension_semantics=("arbitrary",)),  # reduction axis; accumulators resident
    )(features)
    # TODO(synk): optional v7x-only dual-TensorCore split of the batch range.
    return loss[0, 0], tmp[0, 0], den[0, 0]


def _reference(features):
    # Pure-JAX reference mirroring the PyTorch module.
    def cosd(a, b):
        x_len = jnp.sqrt(jnp.sum(a * a, axis=1))
        y_len = jnp.sqrt(jnp.sum(b * b, axis=1))
        ip = jnp.sum(a * b, axis=1)
        return jnp.mean(1.0 - ip / (x_len * y_len + 1e-8))

    f = features.astype(jnp.float32)
    tmp = cosd(f[0], f[1]) + cosd(f[0], f[2])
    molecule = tmp + cosd(f[1], f[2]) * 0.01
    denominator = cosd(f[3], f[1]) + cosd(f[3], f[2]) + 1e-5
    return molecule / denominator + tmp * 0.1, tmp, denominator


if __name__ == "__main__":
    # Small deterministic inputs: 4 feature tensors of shape [B=256, D=128].
    key = jax.random.PRNGKey(0)
    B, D = 256, 128
    features = jax.random.normal(key, (4, B, D), dtype=jnp.float32)

    # tile_b=64 -> grid of 4 steps, exercising the accumulate/finalize path.
    loss, tmp, den = discriminator_loss(features, tile_b=64)
    jax.block_until_ready((loss, tmp, den))

    ref_loss, ref_tmp, ref_den = _reference(features)
    assert jnp.allclose(loss, ref_loss, rtol=1e-5, atol=1e-5), (loss, ref_loss)
    assert jnp.allclose(tmp, ref_tmp, rtol=1e-5, atol=1e-5), (tmp, ref_tmp)
    assert jnp.allclose(den, ref_den, rtol=1e-5, atol=1e-5), (den, ref_den)

    print("KERNEL_OK")
</pallas_src>

<mosaic_0001>
module attributes {stable_mosaic.version = 11 : i64} {
  func.func @_disc_loss_kernel(%arg0: i32, %arg1: memref<4x64x128xf32, #tpu.memory_space<vmem>>, %arg2: memref<1x1xf32, #tpu.memory_space<vmem>>, %arg3: memref<1x1xf32, #tpu.memory_space<vmem>>, %arg4: memref<1x1xf32, #tpu.memory_space<vmem>>, %arg5: memref<1x1xf32, #tpu.memory_space<vmem>>, %arg6: memref<1x1xf32, #tpu.memory_space<vmem>>, %arg7: memref<1x1xf32, #tpu.memory_space<vmem>>, %arg8: memref<1x1xf32, #tpu.memory_space<vmem>>, %arg9: memref<1x1xf32, #tpu.memory_space<vmem>>) attributes {dimension_semantics = [#tpu.dimension_semantics<arbitrary>], iteration_bounds = array<i64: 4>, scalar_prefetch = 0 : i64, scratch_operands = 5 : i64, tpu.core_type = #tpu.core_type<tc>, window_params = [{transform_indices = @transform_0, window_bounds = array<i64: 4, 64, 128>}, {pipeline_mode = #tpu.pipeline_mode<synchronous>, transform_indices = @transform_1, window_bounds = array<i64: 1, 1>}, {pipeline_mode = #tpu.pipeline_mode<synchronous>, transform_indices = @transform_2, window_bounds = array<i64: 1, 1>}, {pipeline_mode = #tpu.pipeline_mode<synchronous>, transform_indices = @transform_3, window_bounds = array<i64: 1, 1>}]} {
    %c0_i32 = arith.constant 0 : i32
    %0 = arith.cmpi eq, %arg0, %c0_i32 : i32
    %1 = arith.extui %0 : i1 to i32
    %c0_i32_0 = arith.constant 0 : i32
    %2 = arith.cmpi ne, %1, %c0_i32_0 : i32
    scf.if %2 {
      %cst_53 = arith.constant 0.000000e+00 : f32
      %105 = vector.broadcast %cst_53 : f32 to vector<1x1xf32>
      %c0_54 = arith.constant 0 : index
      %c0_55 = arith.constant 0 : index
      %106 = vector.load %arg5[%c0_54, %c0_55] : memref<1x1xf32, #tpu.memory_space<vmem>>, vector<1x1xf32>
      tpu.vector_store %arg5[%c0_54, %c0_55], %105 {strides = array<i32>} : memref<1x1xf32, #tpu.memory_space<vmem>>, vector<1x1xf32>,
      %cst_56 = arith.constant 0.000000e+00 : f32
      %107 = vector.broadcast %cst_56 : f32 to vector<1x1xf32>
      %c0_57 = arith.constant 0 : index
      %c0_58 = arith.constant 0 : index
      %108 = vector.load %arg6[%c0_57, %c0_58] : memref<1x1xf32, #tpu.memory_space<vmem>>, vector<1x1xf32>
      tpu.vector_store %arg6[%c0_57, %c0_58], %107 {strides = array<i32>} : memref<1x1xf32, #tpu.memory_space<vmem>>, vector<1x1xf32>,
      %cst_59 = arith.constant 0.000000e+00 : f32
      %109 = vector.broadcast %cst_59 : f32 to vector<1x1xf32>
      %c0_60 = arith.constant 0 : index
      %c0_61 = arith.constant 0 : index
      %110 = vector.load %arg7[%c0_60, %c0_61] : memref<1x1xf32, #tpu.memory_space<vmem>>, vector<1x1xf32>
      tpu.vector_store %arg7[%c0_60, %c0_61], %109 {strides = array<i32>} : memref<1x1xf32, #tpu.memory_space<vmem>>, vector<1x1xf32>,
      %cst_62 = arith.constant 0.000000e+00 : f32
      %111 = vector.broadcast %cst_62 : f32 to vector<1x1xf32>
      %c0_63 = arith.constant 0 : index
      %c0_64 = arith.constant 0 : index
      %112 = vector.load %arg8[%c0_63, %c0_64] : memref<1x1xf32, #tpu.memory_space<vmem>>, vector<1x1xf32>
      tpu.vector_store %arg8[%c0_63, %c0_64], %111 {strides = array<i32>} : memref<1x1xf32, #tpu.memory_space<vmem>>, vector<1x1xf32>,
      %cst_65 = arith.constant 0.000000e+00 : f32
      %113 = vector.broadcast %cst_65 : f32 to vector<1x1xf32>
      %c0_66 = arith.constant 0 : index
      %c0_67 = arith.constant 0 : index
      %114 = vector.load %arg9[%c0_66, %c0_67] : memref<1x1xf32, #tpu.memory_space<vmem>>, vector<1x1xf32>
      tpu.vector_store %arg9[%c0_66, %c0_67], %113 {strides = array<i32>} : memref<1x1xf32, #tpu.memory_space<vmem>>, vector<1x1xf32>,
    } else {
    }
    %c0 = arith.constant 0 : index
    %c0_1 = arith.constant 0 : index
    %c0_2 = arith.constant 0 : index
    %3 = vector.load %arg1[%c0, %c0_1, %c0_2] : memref<4x64x128xf32, #tpu.memory_space<vmem>>, vector<1x64x128xf32>
    %4 = vector.shape_cast %3 : vector<1x64x128xf32> to vector<64x128xf32>
    %c1 = arith.constant 1 : index
    %c0_3 = arith.constant 0 : index
    %c0_4 = arith.constant 0 : index
    %5 = vector.load %arg1[%c1, %c0_3, %c0_4] : memref<4x64x128xf32, #tpu.memory_space<vmem>>, vector<1x64x128xf32>
    %6 = vector.shape_cast %5 : vector<1x64x128xf32> to vector<64x128xf32>
    %c2 = arith.constant 2 : index
    %c0_5 = arith.constant 0 : index
    %c0_6 = arith.constant 0 : index
    %7 = vector.load %arg1[%c2, %c0_5, %c0_6] : memref<4x64x128xf32, #tpu.memory_space<vmem>>, vector<1x64x128xf32>
    %8 = vector.shape_cast %7 : vector<1x64x128xf32> to vector<64x128xf32>
    %c3 = arith.constant 3 : index
    %c0_7 = arith.constant 0 : index
    %c0_8 = arith.constant 0 : index
    %9 = vector.load %arg1[%c3, %c0_7, %c0_8] : memref<4x64x128xf32, #tpu.memory_space<vmem>>, vector<1x64x128xf32>
    %10 = vector.shape_cast %9 : vector<1x64x128xf32> to vector<64x128xf32>
    %11 = arith.mulf %4, %4 : vector<64x128xf32>
    %cst = arith.constant dense<0.000000e+00> : vector<64xf32>
    %12 = vector.multi_reduction <add>, %11, %cst [1] : vector<64x128xf32> to vector<64xf32>
    %13 = vector.shape_cast %12 : vector<64xf32> to vector<64x1xf32>
    %14 = math.sqrt %13 : vector<64x1xf32>
    %15 = arith.mulf %6, %6 : vector<64x128xf32>
    %cst_9 = arith.constant dense<0.000000e+00> : vector<64xf32>
    %16 = vector.multi_reduction <add>, %15, %cst_9 [1] : vector<64x128xf32> to vector<64xf32>
    %17 = vector.shape_cast %16 : vector<64xf32> to vector<64x1xf32>
    %18 = math.sqrt %17 : vector<64x1xf32>
    %19 = arith.mulf %8, %8 : vector<64x128xf32>
    %cst_10 = arith.constant dense<0.000000e+00> : vector<64xf32>
    %20 = vector.multi_reduction <add>, %19, %cst_10 [1] : vector<64x128xf32> to vector<64xf32>
    %21 = vector.shape_cast %20 : vector<64xf32> to vector<64x1xf32>
    %22 = math.sqrt %21 : vector<64x1xf32>
    %23 = arith.mulf %10, %10 : vector<64x128xf32>
    %cst_11 = arith.constant dense<0.000000e+00> : vector<64xf32>
    %24 = vector.multi_reduction <add>, %23, %cst_11 [1] : vector<64x128xf32> to vector<64xf32>
    %25 = vector.shape_cast %24 : vector<64xf32> to vector<64x1xf32>
    %26 = math.sqrt %25 : vector<64x1xf32>
    %c0_12 = arith.constant 0 : index
    %c0_13 = arith.constant 0 : index
    %27 = vector.load %arg5[%c0_12, %c0_13] : memref<1x1xf32, #tpu.memory_space<vmem>>, vector<1x1xf32>
    %28 = arith.mulf %4, %6 : vector<64x128xf32>
    %cst_14 = arith.constant dense<0.000000e+00> : vector<64xf32>
    %29 = vector.multi_reduction <add>, %28, %cst_14 [1] : vector<64x128xf32> to vector<64xf32>
    %30 = vector.shape_cast %29 : vector<64xf32> to vector<64x1xf32>
    %31 = arith.mulf %14, %18 : vector<64x1xf32>
    %cst_15 = arith.constant 9.99999993E-9 : f32
    %32 = vector.broadcast %cst_15 : f32 to vector<64x1xf32>
    %33 = arith.addf %31, %32 : vector<64x1xf32>
    %34 = tpu.reciprocal %33 : vector<64x1xf32> -> vector<64x1xf32>
    %35 = arith.mulf %30, %34 : vector<64x1xf32>
    %cst_16 = arith.constant 1.000000e+00 : f32
    %36 = vector.broadcast %cst_16 : f32 to vector<64x1xf32>
    %37 = arith.subf %36, %35 : vector<64x1xf32>
    %cst_17 = arith.constant dense<0.000000e+00> : vector<1xf32>
    %38 = vector.multi_reduction <add>, %37, %cst_17 [0] : vector<64x1xf32> to vector<1xf32>
    %39 = vector.shape_cast %38 : vector<1xf32> to vector<1x1xf32>
    %40 = arith.addf %27, %39 : vector<1x1xf32>
    %c0_18 = arith.constant 0 : index
    %c0_19 = arith.constant 0 : index
    %41 = vector.load %arg5[%c0_18, %c0_19] : memref<1x1xf32, #tpu.memory_space<vmem>>, vector<1x1xf32>
    tpu.vector_store %arg5[%c0_18, %c0_19], %40 {strides = array<i32>} : memref<1x1xf32, #tpu.memory_space<vmem>>, vector<1x1xf32>,
    %c0_20 = arith.constant 0 : index
    %c0_21 = arith.constant 0 : index
    %42 = vector.load %arg6[%c0_20, %c0_21] : memref<1x1xf32, #tpu.memory_space<vmem>>, vector<1x1xf32>
    %43 = arith.mulf %4, %8 : vector<64x128xf32>
    %cst_22 = arith.constant dense<0.000000e+00> : vector<64xf32>
    %44 = vector.multi_reduction <add>, %43, %cst_22 [1] : vector<64x128xf32> to vector<64xf32>
    %45 = vector.shape_cast %44 : vector<64xf32> to vector<64x1xf32>
    %46 = arith.mulf %14, %22 : vector<64x1xf32>
    %cst_23 = arith.constant 9.99999993E-9 : f32
    %47 = vector.broadcast %cst_23 : f32 to vector<64x1xf32>
    %48 = arith.addf %46, %47 : vector<64x1xf32>
    %49 = tpu.reciprocal %48 : vector<64x1xf32> -> vector<64x1xf32>
    %50 = arith.mulf %45, %49 : vector<64x1xf32>
    %cst_24 = arith.constant 1.000000e+00 : f32
    %51 = vector.broadcast %cst_24 : f32 to vector<64x1xf32>
    %52 = arith.subf %51, %50 : vector<64x1xf32>
    %cst_25 = arith.constant dense<0.000000e+00> : vector<1xf32>
    %53 = vector.multi_reduction <add>, %52, %cst_25 [0] : vector<64x1xf32> to vector<1xf32>
    %54 = vector.shape_cast %53 : vector<1xf32> to vector<1x1xf32>
    %55 = arith.addf %42, %54 : vector<1x1xf32>
    %c0_26 = arith.constant 0 : index
    %c0_27 = arith.constant 0 : index
    %56 = vector.load %arg6[%c0_26, %c0_27] : memref<1x1xf32, #tpu.memory_space<vmem>>, vector<1x1xf32>
    tpu.vector_store %arg6[%c0_26, %c0_27], %55 {strides = array<i32>} : memref<1x1xf32, #tpu.memory_space<vmem>>, vector<1x1xf32>,
    %c0_28 = arith.constant 0 : index
    %c0_29 = arith.constant 0 : index
    %57 = vector.load %arg7[%c0_28, %c0_29] : memref<1x1xf32, #tpu.memory_space<vmem>>, vector<1x1xf32>
    %58 = arith.mulf %6, %8 : vector<64x128xf32>
    %cst_30 = arith.constant dense<0.000000e+00> : vector<64xf32>
    %59 = vector.multi_reduction <add>, %58, %cst_30 [1] : vector<64x128xf32> to vector<64xf32>
    %60 = vector.shape_cast %59 : vector<64xf32> to vector<64x1xf32>
    %61 = arith.mulf %18, %22 : vector<64x1xf32>
    %cst_31 = arith.constant 9.99999993E-9 : f32
    %62 = vector.broadcast %cst_31 : f32 to vector<64x1xf32>
    %63 = arith.addf %61, %62 : vector<64x1xf32>
    %64 = tpu.reciprocal %63 : vector<64x1xf32> -> vector<64x1xf32>
    %65 = arith.mulf %60, %64 : vector<64x1xf32>
    %cst_32 = arith.constant 1.000000e+00 : f32
    %66 = vector.broadcast %cst_32 : f32 to vector<64x1xf32>
    %67 = arith.subf %66, %65 : vector<64x1xf32>
    %cst_33 = arith.constant dense<0.000000e+00> : vector<1xf32>
    %68 = vector.multi_reduction <add>, %67, %cst_33 [0] : vector<64x1xf32> to vector<1xf32>
    %69 = vector.shape_cast %68 : vector<1xf32> to vector<1x1xf32>
    %70 = arith.addf %57, %69 : vector<1x1xf32>
    %c0_34 = arith.constant 0 : index
    %c0_35 = arith.constant 0 : index
    %71 = vector.load %arg7[%c0_34, %c0_35] : memref<1x1xf32, #tpu.memory_space<vmem>>, vector<1x1xf32>
    tpu.vector_store %arg7[%c0_34, %c0_35], %70 {strides = array<i32>} : memref<1x1xf32, #tpu.memory_space<vmem>>, vector<1x1xf32>,
    %c0_36 = arith.constant 0 : index
    %c0_37 = arith.constant 0 : index
    %72 = vector.load %arg8[%c0_36, %c0_37] : memref<1x1xf32, #tpu.memory_space<vmem>>, vector<1x1xf32>
    %73 = arith.mulf %10, %6 : vector<64x128xf32>
    %cst_38 = arith.constant dense<0.000000e+00> : vector<64xf32>
    %74 = vector.multi_reduction <add>, %73, %cst_38 [1] : vector<64x128xf32> to vector<64xf32>
    %75 = vector.shape_cast %74 : vector<64xf32> to vector<64x1xf32>
    %76 = arith.mulf %26, %18 : vector<64x1xf32>
    %cst_39 = arith.constant 9.99999993E-9 : f32
    %77 = vector.broadcast %cst_39 : f32 to vector<64x1xf32>
    %78 = arith.addf %76, %77 : vector<64x1xf32>
    %79 = tpu.reciprocal %78 : vector<64x1xf32> -> vector<64x1xf32>
    %80 = arith.mulf %75, %79 : vector<64x1xf32>
    %cst_40 = arith.constant 1.000000e+00 : f32
    %81 = vector.broadcast %cst_40 : f32 to vector<64x1xf32>
    %82 = arith.subf %81, %80 : vector<64x1xf32>
    %cst_41 = arith.constant dense<0.000000e+00> : vector<1xf32>
    %83 = vector.multi_reduction <add>, %82, %cst_41 [0] : vector<64x1xf32> to vector<1xf32>
    %84 = vector.shape_cast %83 : vector<1xf32> to vector<1x1xf32>
    %85 = arith.addf %72, %84 : vector<1x1xf32>
    %c0_42 = arith.constant 0 : index
    %c0_43 = arith.constant 0 : index
    %86 = vector.load %arg8[%c0_42, %c0_43] : memref<1x1xf32, #tpu.memory_space<vmem>>, vector<1x1xf32>
    tpu.vector_store %arg8[%c0_42, %c0_43], %85 {strides = array<i32>} : memref<1x1xf32, #tpu.memory_space<vmem>>, vector<1x1xf32>,
    %c0_44 = arith.constant 0 : index
    %c0_45 = arith.constant 0 : index
    %87 = vector.load %arg9[%c0_44, %c0_45] : memref<1x1xf32, #tpu.memory_space<vmem>>, vector<1x1xf32>
    %88 = arith.mulf %10, %8 : vector<64x128xf32>
    %cst_46 = arith.constant dense<0.000000e+00> : vector<64xf32>
    %89 = vector.multi_reduction <add>, %88, %cst_46 [1] : vector<64x128xf32> to vector<64xf32>
    %90 = vector.shape_cast %89 : vector<64xf32> to vector<64x1xf32>
    %91 = arith.mulf %26, %22 : vector<64x1xf32>
    %cst_47 = arith.constant 9.99999993E-9 : f32
    %92 = vector.broadcast %cst_47 : f32 to vector<64x1xf32>
    %93 = arith.addf %91, %92 : vector<64x1xf32>
    %94 = tpu.reciprocal %93 : vector<64x1xf32> -> vector<64x1xf32>
    %95 = arith.mulf %90, %94 : vector<64x1xf32>
    %cst_48 = arith.constant 1.000000e+00 : f32
    %96 = vector.broadcast %cst_48 : f32 to vector<64x1xf32>
    %97 = arith.subf %96, %95 : vector<64x1xf32>
    %cst_49 = arith.constant dense<0.000000e+00> : vector<1xf32>
    %98 = vector.multi_reduction <add>, %97, %cst_49 [0] : vector<64x1xf32> to vector<1xf32>
    %99 = vector.shape_cast %98 : vector<1xf32> to vector<1x1xf32>
    %100 = arith.addf %87, %99 : vector<1x1xf32>
    %c0_50 = arith.constant 0 : index
    %c0_51 = arith.constant 0 : index
    %101 = vector.load %arg9[%c0_50, %c0_51] : memref<1x1xf32, #tpu.memory_space<vmem>>, vector<1x1xf32>
    tpu.vector_store %arg9[%c0_50, %c0_51], %100 {strides = array<i32>} : memref<1x1xf32, #tpu.memory_space<vmem>>, vector<1x1xf32>,
    %c3_i32 = arith.constant 3 : i32
    %102 = arith.cmpi eq, %arg0, %c3_i32 : i32
    %103 = arith.extui %102 : i1 to i32
    %c0_i32_52 = arith.constant 0 : i32
    %104 = arith.cmpi ne, %103, %c0_i32_52 : i32
    scf.if %104 {
      %c0_53 = arith.constant 0 : index
      %c0_54 = arith.constant 0 : index
      %105 = vector.load %arg5[%c0_53, %c0_54] : memref<1x1xf32, #tpu.memory_space<vmem>>, vector<1x1xf32>
      %c0_55 = arith.constant 0 : index
      %c0_56 = arith.constant 0 : index
      %106 = vector.load %arg6[%c0_55, %c0_56] : memref<1x1xf32, #tpu.memory_space<vmem>>, vector<1x1xf32>
      %107 = arith.addf %105, %106 : vector<1x1xf32>
      %cst_57 = arith.constant 3.906250e-03 : f32
      %108 = vector.broadcast %cst_57 : f32 to vector<1x1xf32>
      %109 = arith.mulf %107, %108 : vector<1x1xf32>
      %c0_58 = arith.constant 0 : index
      %c0_59 = arith.constant 0 : index
      %110 = vector.load %arg7[%c0_58, %c0_59] : memref<1x1xf32, #tpu.memory_space<vmem>>, vector<1x1xf32>
      %cst_60 = arith.constant 3.906250e-05 : f32
      %111 = vector.broadcast %cst_60 : f32 to vector<1x1xf32>
      %112 = arith.mulf %110, %111 : vector<1x1xf32>
      %113 = arith.addf %109, %112 : vector<1x1xf32>
      %c0_61 = arith.constant 0 : index
      %c0_62 = arith.constant 0 : index
      %114 = vector.load %arg8[%c0_61, %c0_62] : memref<1x1xf32, #tpu.memory_space<vmem>>, vector<1x1xf32>
      %c0_63 = arith.constant 0 : index
      %c0_64 = arith.constant 0 : index
      %115 = vector.load %arg9[%c0_63, %c0_64] : memref<1x1xf32, #tpu.memory_space<vmem>>, vector<1x1xf32>
      %116 = arith.addf %114, %115 : vector<1x1xf32>
      %cst_65 = arith.constant 3.906250e-03 : f32
      %117 = vector.broadcast %cst_65 : f32 to vector<1x1xf32>
      %118 = arith.mulf %116, %117 : vector<1x1xf32>
      %cst_66 = arith.constant 9.99999974E-6 : f32
      %119 = vector.broadcast %cst_66 : f32 to vector<1x1xf32>
      %120 = arith.addf %118, %119 : vector<1x1xf32>
      %121 = tpu.reciprocal %120 : vector<1x1xf32> -> vector<1x1xf32>
      %122 = arith.mulf %113, %121 : vector<1x1xf32>
      %cst_67 = arith.constant 1.000000e-01 : f32
      %123 = vector.broadcast %cst_67 : f32 to vector<1x1xf32>
      %124 = arith.mulf %109, %123 : vector<1x1xf32>
      %125 = arith.addf %122, %124 : vector<1x1xf32>
      %c0_68 = arith.constant 0 : index
      %c0_69 = arith.constant 0 : index
      %126 = vector.load %arg2[%c0_68, %c0_69] : memref<1x1xf32, #tpu.memory_space<vmem>>, vector<1x1xf32>
      tpu.vector_store %arg2[%c0_68, %c0_69], %125 {strides = array<i32>} : memref<1x1xf32, #tpu.memory_space<vmem>>, vector<1x1xf32>,
      %c0_70 = arith.constant 0 : index
      %c0_71 = arith.constant 0 : index
      %127 = vector.load %arg3[%c0_70, %c0_71] : memref<1x1xf32, #tpu.memory_space<vmem>>, vector<1x1xf32>
      tpu.vector_store %arg3[%c0_70, %c0_71], %109 {strides = array<i32>} : memref<1x1xf32, #tpu.memory_space<vmem>>, vector<1x1xf32>,
      %c0_72 = arith.constant 0 : index
      %c0_73 = arith.constant 0 : index
      %128 = vector.load %arg4[%c0_72, %c0_73] : memref<1x1xf32, #tpu.memory_space<vmem>>, vector<1x1xf32>
      tpu.vector_store %arg4[%c0_72, %c0_73], %120 {strides = array<i32>} : memref<1x1xf32, #tpu.memory_space<vmem>>, vector<1x1xf32>,
    } else {
    }
    return
  }
  func.func @transform_0(%arg0: i32) -> (i32, i32, i32) {
    %c0_i32 = arith.constant 0 : i32
    %c0_i32_0 = arith.constant 0 : i32
    %c0_i32_1 = arith.constant 0 : i32
    return %c0_i32, %arg0, %c0_i32_0 : i32, i32, i32
  }
  func.func @transform_1(%arg0: i32) -> (i32, i32) {
    %c0_i32 = arith.constant 0 : i32
    %c0_i32_0 = arith.constant 0 : i32
    %c0_i32_1 = arith.constant 0 : i32
    return %c0_i32, %c0_i32_0 : i32, i32
  }
  func.func @transform_2(%arg0: i32) -> (i32, i32) {
    %c0_i32 = arith.constant 0 : i32
    %c0_i32_0 = arith.constant 0 : i32
    %c0_i32_1 = arith.constant 0 : i32
    return %c0_i32, %c0_i32_0 : i32, i32
  }
  func.func @transform_3(%arg0: i32) -> (i32, i32) {
    %c0_i32 = arith.constant 0 : i32
    %c0_i32_0 = arith.constant 0 : i32
    %c0_i32_1 = arith.constant 0 : i32
    return %c0_i32, %c0_i32_0 : i32, i32
  }
}

</mosaic_0001>

<bundles_post_ra>
// kernel: tpu_custom_call.1
= control target key start
LH: loop header
LB: loop body
LE: loop exit
PB: predicated region body
PF: predicated region fallthrough
CT: control target
= control target key end

     0   :  { %9 = vsyncpa [#allocation8], 0  ;;  %s4097_s0 = inlined_call_operand.hbm [shape: f32[4,256,128], index: 0, kind: input, shape index: {}]   ;;  %s4098_s1 = inlined_call_operand.hbm [shape: f32[1,1], index: 1, kind: output, shape index: {0}]   ;;  %s4099_s2 = inlined_call_operand.hbm [shape: f32[1,1], index: 2, kind: output, shape index: {1}]   ;;  %s4100_s3 = inlined_call_operand.hbm [shape: f32[1,1], index: 3, kind: output, shape index: {2}]  }
   0x1   :  { %11 = vsyncpa [#allocation8 + $0x1], 0 }
   0x2   :  { %12 = vsyncpa [#allocation9], 0 }
   0x3   :  { %13 = vsyncpa [#allocation12], 0  ;;  %s2205_s12 = smov 0   ;;  %s2207_s13 = smov 0  }
   0x4   :  { %s2209_s14 = smov 0   ;;  %s2211_s15 = smov 0  }
   0x5 LB: > { %s2224_s16 = sadd.s32 4294967295, %s2174_s15   ;;  %s2227_s17 = sadd.s32 1, %s2174_s15   ;;  %s2174_s15 = sphi %s2211_s15, %s4230_s15   ;;  %s2170_s14 = sphi %s2209_s14, %s4229_s14   ;;  %s2166_s13 = sphi %s2207_s13, %s4228_s13   ;;  %s2162_s12 = sphi %s2205_s12, %s4227_s12  }
   0x6   : > { %s23_s18 = ssub.s32 %s2174_s15, %s2227_s17  ;;  %s26_s19 = sadd.s32 1, %s2170_s14 }
   0x7   : > { %p24_p0 = scmp.eq.s32.totalorder %s23_s18, 0  ;;  %p33_p1 = scmp.ne.s32.totalorder %s2170_s14, %s2166_s13 }
   0x8   : > { %p34_p2 = scmp.eq.s32.totalorder %s2174_s15, 0  ;;  %p39_p3 = scmp.ne.s32.totalorder %s2166_s13, %s2162_s12 }
   0x9   : > { %s2237_s20 = scalar_select %p24_p0, %s2170_s14, %s26_s19  }
   0xa   : > { %p2239_p4 = por %p34_p2, %p33_p1  ;;  %p40_p5 = scmp.eq.s32.totalorder %s2224_s16, 0 }
   0xb   : > { %p1791_p7 = scmp.ge.s32.totalorder %s2174_s15, 4 }
   0xc   : > { %p2244_p6 = por %p40_p5, %p39_p3 }
   0xd   : > { %122 = sbr.rel (%p1791_p7) target bundleno = 31 (0x1f), region = 16 }
  0x12   : > { %s126_s23 = sand.u32 1, %s2170_s14   ;;  %s1833_s24 = sshll.u32 %s2174_s15, 6 }
  0x13   : > { %s1792_s25 = sshll.u32 %s126_s23, 8  ;;  %s135_s28 = scalar_lea.hbm %s4097_s0, %s1833_s24 }
  0x14   : > { %s1834_s29 = scalar_select %p2239_p4, [#allocation0], [#allocation16] }
  0x15   : > { %s148_s30 = sshll.u32 %s135_s28, 4  ;;  %s130_s4 = scalar_lea.vmem [#allocation7], %s1792_s25  ;;  %s149_s30 = int_to_ptr.hbm [resolvable:$true] %s148_s30 }
  0x16   : > { %s150_s5 = sshll.u32 %s130_s4, 4  ;;  %s140_s6 = sld [smem:[%s1834_s29]]   ;;  %s151_s5 = int_to_ptr.vmem [resolvable:$true] %s150_s5 }
  0x17   : > { %s2176_s7 = smov 4096   ;;  %s2177_s8 = smov 1024  }
  0x18   : > { %1835 = sst [smem:[#allocation15]] (%p2239_p4), %s2176_s7  ;;  %s2178_s9 = smov 8  }
  0x19   : > { %1836 = sst [smem:[#allocation15 + $0x1]] (%p2239_p4), %s2177_s8  ;;  %s2179_s10 = smov 128  }
  0x1a   : > { %1837 = sst [smem:[#allocation15 + $0x2]] (%p2239_p4), %s2178_s9  ;;  %s127_s18 = scalar_lea.sflag [#allocation8], %s126_s23 }
  0x1b   : > { %1838 = sst [smem:[#allocation15 + $0x3]] (%p2239_p4), %s2179_s10  ;;  %s2180_s19 = smov [#allocation14]  }
  0x1c   : > { %s1795_s11 = sshll.u32 %s140_s6, 26  ;;  %1839 = sst [smem:[#allocation15 + $0x4]] (%p2239_p4), %s2179_s10 }
  0x1d   : > { %s1796_s12 = sadd.s32 134217728, %s1795_s11  ;;  %1840 = sst [smem:[#allocation15 + $0x5]] (%p2239_p4), %s2178_s9 }
  0x1e   : > { %1841 = dma.general (%p2239_p4), %s149_s30, 4096, %s151_s5, %s127_s18, %s2180_s19, [#allocation15], %s1796_s12, 0  }
  0x1f PF: > { %p1797_p8 = scmp.ge.s32.totalorder %s2174_s15, 1  ;;  %p171_p9 = scmp.lt.s32.totalorder %s2174_s15, 5 }
  0x21   : > { %p172_p10 = pnand %p1797_p8, %p171_p9 }
  0x23   : > { %175 = sbr.rel (%p172_p10) target bundleno = 533 (0x215), region = 24 }
  0x28   : > { %s177_s24 = sand.u32 1, %s2166_s13  }
  0x29   : > { %s1798_s25 = sshll.u32 %s177_s24, 8  ;;  %s178_s26 = scalar_lea.sflag [#allocation8], %s177_s24 }
  0x2a   : > { %s2273_s27 = scalar_lea.vmem [#allocation7], %s1798_s25 }
  0x2b   : > { %2149 = dma.done.wait (%p2244_p6), %s178_s26, 4096  }
  0x2c   : > { %2151 = vsyncadd (%p2244_p6), %s178_s26, 4294963200  ;;  %p1799_p11 = scmp.ne.s32.totalorder %s2224_s16, 0 }
  0x2e   : > { %204 = sbr.rel (%p1799_p11) target bundleno = 57 (0x39), region = 32 }
  0x33   : > { %vm205_vm0 = vcmask 0   ;;  %v2181_v0 = vmov 0.0  }
  0x34   : > { %206 = vst.msk [vmem:[#allocation2] sm:$0x1] %vm205_vm0, %v2181_v0 }
  0x35   : > { %207 = vst.msk [vmem:[#allocation3] sm:$0x1] %vm205_vm0, %v2181_v0 }
  0x36   : > { %208 = vst.msk [vmem:[#allocation4] sm:$0x1] %vm205_vm0, %v2181_v0 }
  0x37   : > { %209 = vst.msk [vmem:[#allocation5] sm:$0x1] %vm205_vm0, %v2181_v0 }
  0x38   : > { %210 = vst.msk [vmem:[#allocation6] sm:$0x1] %vm205_vm0, %v2181_v0 }
  0x39 PF: > { %v2281_v1 = vld [vmem:[%s2273_s27 + $0x20] sm:$0xff]  ;;  %v2284_v2 = vld [vmem:[%s2273_s27 + $0x10] sm:$0xff]  ;;  %v2296_v7 = vld [vmem:[%s2273_s27 + $0x28] sm:$0xff]  ;;  %p1824_p12 = scmp.ne.s32.totalorder %s2224_s16, 3 }
  0x3a   : > { %v2287_v3 = vld [vmem:[%s2273_s27] sm:$0xff]  ;;  %v250_v4 = vmul.f32 %v2281_v1, %v2281_v1  ;;  %v248_v5 = vmul.f32 %v2284_v2, %v2284_v2  ;;  %v2299_v8 = vld [vmem:[%s2273_s27 + $0x18] sm:$0xff]  ;;  %v2302_v9 = vld [vmem:[%s2273_s27 + $0x8] sm:$0xff]  ;;  %v251_v10 = vmul.f32 %v2296_v7, %v2296_v7 }
  0x3b   : > { %v246_v6 = vmul.f32 %v2287_v3, %v2287_v3  ;;  %v249_v11 = vmul.f32 %v2299_v8, %v2299_v8  ;;  %v247_v12 = vmul.f32 %v2302_v9, %v2302_v9  ;;  %v2311_v13 = vld [vmem:[%s2273_s27 + $0x40] sm:$0xff]  ;;  %v2314_v14 = vld [vmem:[%s2273_s27 + $0x38] sm:$0xff]  ;;  %v2317_v15 = vld [vmem:[%s2273_s27 + $0x30] sm:$0xff] }
  0x3c   : > { %262 = vadd.xlane.f32.xlu2 %v250_v4  ;;  %258 = vadd.xlane.f32.xlu1 %v248_v5  ;;  %v366_v16 = vmul.f32 %v2311_v13, %v2311_v13  ;;  %v253_v17 = vmul.f32 %v2314_v14, %v2314_v14  ;;  %v252_v18 = vmul.f32 %v2317_v15, %v2317_v15  ;;  %v2326_v19 = vld [vmem:[%s2273_s27 + $0x58] sm:$0xff]  ;;  %v2329_v20 = vld [vmem:[%s2273_s27 + $0x50] sm:$0xff]  ;;  %v2332_v21 = vld [vmem:[%s2273_s27 + $0x48] sm:$0xff] }
  0x3d   : > { %254 = vadd.xlane.f32.xlu0 %v246_v6  ;;  %v369_v22 = vmul.f32 %v2326_v19, %v2326_v19  ;;  %v368_v23 = vmul.f32 %v2329_v20, %v2329_v20  ;;  %v367_v24 = vmul.f32 %v2332_v21, %v2332_v21  ;;  %v2341_v25 = vld [vmem:[%s2273_s27 + $0x70] sm:$0xff]  ;;  %v2344_v26 = vld [vmem:[%s2273_s27 + $0x68] sm:$0xff]  ;;  %v2347_v27 = vld [vmem:[%s2273_s27 + $0x60] sm:$0xff]  ;;  %v727_v0 = vmul.f32 %v2311_v13, %v2287_v3 }
  0x3e   : > { %v372_v28 = vmul.f32 %v2341_v25, %v2341_v25  ;;  %v371_v29 = vmul.f32 %v2344_v26, %v2344_v26  ;;  %v370_v30 = vmul.f32 %v2347_v27, %v2347_v27  ;;  %v2356_v31 = vld [vmem:[%s2273_s27 + $0x88] sm:$0xff]  ;;  %v2359_v32 = vld [vmem:[%s2273_s27 + $0x80] sm:$0xff]  ;;  %v2362_v33 = vld [vmem:[%s2273_s27 + $0x78] sm:$0xff]  ;;  %v729_v5 = vmul.f32 %v2329_v20, %v2284_v2 }
  0x3f   : > { %v487_v34 = vmul.f32 %v2356_v31, %v2356_v31  ;;  %v486_v35 = vmul.f32 %v2359_v32, %v2359_v32  ;;  %v373_v36 = vmul.f32 %v2362_v33, %v2362_v33  ;;  %v2371_v37 = vld [vmem:[%s2273_s27 + $0xa0] sm:$0xff]  ;;  %v2374_v38 = vld [vmem:[%s2273_s27 + $0x98] sm:$0xff]  ;;  %v2377_v39 = vld [vmem:[%s2273_s27 + $0x90] sm:$0xff]  ;;  %v730_v6 = vmul.f32 %v2326_v19, %v2299_v8 }
  0x40   : > { %v490_v40 = vmul.f32 %v2371_v37, %v2371_v37  ;;  %v489_v41 = vmul.f32 %v2374_v38, %v2374_v38  ;;  %v488_v42 = vmul.f32 %v2377_v39, %v2377_v39  ;;  %v2386_v43 = vld [vmem:[%s2273_s27 + $0xb8] sm:$0xff]  ;;  %v2389_v44 = vld [vmem:[%s2273_s27 + $0xb0] sm:$0xff]  ;;  %v2392_v45 = vld [vmem:[%s2273_s27 + $0xa8] sm:$0xff] }
  0x41   : > { %v493_v46 = vmul.f32 %v2386_v43, %v2386_v43  ;;  %v492_v47 = vmul.f32 %v2389_v44, %v2389_v44  ;;  %v491_v48 = vmul.f32 %v2392_v45, %v2392_v45  ;;  %v2401_v49 = vld [vmem:[%s2273_s27 + $0xd0] sm:$0xff]  ;;  %v2404_v50 = vld [vmem:[%s2273_s27 + $0xc8] sm:$0xff]  ;;  %v2407_v51 = vld [vmem:[%s2273_s27 + $0xc0] sm:$0xff] }
  0x42   : > { %v608_v52 = vmul.f32 %v2401_v49, %v2401_v49  ;;  %v607_v53 = vmul.f32 %v2404_v50, %v2404_v50  ;;  %v606_v54 = vmul.f32 %v2407_v51, %v2407_v51  ;;  %v2416_v55 = vld [vmem:[%s2273_s27 + $0xe8] sm:$0xff]  ;;  %v2419_v56 = vld [vmem:[%s2273_s27 + $0xe0] sm:$0xff]  ;;  %v2422_v57 = vld [vmem:[%s2273_s27 + $0xd8] sm:$0xff] }
  0x43   : > { %v611_v58 = vmul.f32 %v2416_v55, %v2416_v55  ;;  %v610_v59 = vmul.f32 %v2419_v56, %v2419_v56  ;;  %v609_v60 = vmul.f32 %v2422_v57, %v2422_v57  ;;  %v2431_v61 = vld [vmem:[%s2273_s27 + $0xf8] sm:$0xff]  ;;  %v2434_v62 = vld [vmem:[%s2273_s27 + $0xf0] sm:$0xff] }
  0x44   : > { %264 = vadd.xlane.f32.xlu2 %v251_v10  ;;  %260 = vadd.xlane.f32.xlu1 %v249_v11  ;;  %v613_v63 = vmul.f32 %v2431_v61, %v2431_v61  ;;  %v612_v4 = vmul.f32 %v2434_v62, %v2434_v62  ;;  %v728_v10 = vmul.f32 %v2332_v21, %v2302_v9 }
  0x45   : > { %256 = vadd.xlane.f32.xlu0 %v247_v12  ;;  %v732_v11 = vmul.f32 %v2344_v26, %v2296_v7  ;;  %v733_v12 = vmul.f32 %v2341_v25, %v2317_v15 }
  0x4c   : > { %374 = vadd.xlane.f32.xlu2 %v366_v16  ;;  %268 = vadd.xlane.f32.xlu1 %v253_v17  ;;  %v731_v16 = vmul.f32 %v2347_v27, %v2281_v1  ;;  %v912_v17 = vmul.f32 %v2359_v32, %v2287_v3 }
  0x4d   : > { %266 = vadd.xlane.f32.xlu0 %v252_v18  ;;  %v913_v18 = vmul.f32 %v2356_v31, %v2302_v9 }
  0x54   : > { %380 = vadd.xlane.f32.xlu2 %v369_v22  ;;  %378 = vadd.xlane.f32.xlu1 %v368_v23  ;;  %v734_v22 = vmul.f32 %v2362_v33, %v2314_v14  ;;  %v915_v23 = vmul.f32 %v2374_v38, %v2299_v8  ;;  %v919_v8 = vmul.f32 %v2386_v43, %v2314_v14 }
  0x55   : > { %376 = vadd.xlane.f32.xlu0 %v367_v24  ;;  %v916_v24 = vmul.f32 %v2371_v37, %v2281_v1  ;;  %v917_v1 = vmul.f32 %v2392_v45, %v2296_v7  ;;  %v1096_v14 = vmul.f32 %v2359_v32, %v2311_v13 }
  0x5c   : > { %386 = vadd.xlane.f32.xlu2 %v372_v28  ;;  %384 = vadd.xlane.f32.xlu1 %v371_v29  ;;  %v914_v28 = vmul.f32 %v2377_v39, %v2284_v2 }
  0x5d   : > { %382 = vadd.xlane.f32.xlu0 %v370_v30  ;;  %v918_v30 = vmul.f32 %v2389_v44, %v2317_v15  ;;  %v1280_v15 = vmul.f32 %v2407_v51, %v2311_v13  ;;  %v1465_v13 = vmul.f32 %v2404_v50, %v2356_v31 }
  0x64   : > { %496 = vadd.xlane.f32.xlu2 %v487_v34  ;;  %494 = vadd.xlane.f32.xlu1 %v486_v35 }
  0x65   : > { %388 = vadd.xlane.f32.xlu0 %v373_v36  ;;  %v1097_v36 = vmul.f32 %v2356_v31, %v2332_v21 }
  0x6c   : > { %502 = vadd.xlane.f32.xlu2 %v490_v40  ;;  %500 = vadd.xlane.f32.xlu1 %v489_v41 }
  0x6d   : > { %498 = vadd.xlane.f32.xlu0 %v488_v42  ;;  %v1464_v42 = vmul.f32 %v2407_v51, %v2359_v32 }
  0x74   : > { %508 = vadd.xlane.f32.xlu2 %v493_v46  ;;  %506 = vadd.xlane.f32.xlu1 %v492_v47  ;;  %v1281_v47 = vmul.f32 %v2404_v50, %v2332_v21  ;;  %v1282_v50 = vmul.f32 %v2401_v49, %v2329_v20 }
  0x75   : > { %504 = vadd.xlane.f32.xlu0 %v491_v48 }
  0x7c   : > { %618 = vadd.xlane.f32.xlu2 %v608_v52  ;;  %616 = vadd.xlane.f32.xlu1 %v607_v53 }
  0x7d   : > { %614 = vadd.xlane.f32.xlu0 %v606_v54  ;;  %v1466_v54 = vmul.f32 %v2401_v49, %v2377_v39 }
  0x84   : > { %624 = vadd.xlane.f32.xlu2 %v611_v58  ;;  %622 = vadd.xlane.f32.xlu1 %v610_v59  ;;  %v1098_v58 = vmul.f32 %v2377_v39, %v2329_v20 }
  0x85   : > { %620 = vadd.xlane.f32.xlu0 %v609_v60 }
  0x8c   : > { %628 = vadd.xlane.f32.xlu1 %v613_v63  ;;  %735 = vadd.xlane.f32.xlu2 %v727_v0 }
  0x8d   : > { %626 = vadd.xlane.f32.xlu0 %v612_v4 }
  0x94   : > { %739 = vadd.xlane.f32.xlu1 %v729_v5  ;;  %741 = vadd.xlane.f32.xlu2 %v730_v6 }
  0x95   : > { %737 = vadd.xlane.f32.xlu0 %v728_v10 }
  0x9c   : > { %745 = vadd.xlane.f32.xlu1 %v732_v11  ;;  %747 = vadd.xlane.f32.xlu2 %v733_v12 }
  0x9d   : > { %743 = vadd.xlane.f32.xlu0 %v731_v16 }
  0xa4   : > { %920 = vadd.xlane.f32.xlu1 %v912_v17  ;;  %922 = vadd.xlane.f32.xlu2 %v913_v18  ;;  %v1283_v18 = vmul.f32 %v2422_v57, %v2326_v19 }
  0xa5   : > { %749 = vadd.xlane.f32.xlu0 %v734_v22 }
  0xac   : > { %926 = vadd.xlane.f32.xlu1 %v915_v23  ;;  %928 = vadd.xlane.f32.xlu2 %v916_v24  ;;  %v1467_v24 = vmul.f32 %v2422_v57, %v2374_v38 }
  0xad   : > { %924 = vadd.xlane.f32.xlu0 %v914_v28  ;;  %v1099_v28 = vmul.f32 %v2374_v38, %v2326_v19 }
  0xaf   : > { %v2466_v3 = vpop.xlane.xlu2 %262  ;;  %v2468_v9 = vpop.xlane.xlu1 %258 }
  0xb0   : > { %v2470_v29 = vpop.xlane.xlu0 %254  ;;  %1902 = vrsqrt.f32 %v2466_v3  ;;  %vm325_vm1 = vcmp.eq.f32.partialorder %v2466_v3, inf  ;;  %vm327_vm2 = vcmp.eq.f32.partialorder %v2466_v3, 0.0  ;;  %vm301_vm3 = vcmp.eq.f32.partialorder %v2468_v9, inf }
  0xb1   : > { %1904 = vrsqrt.f32 %v2468_v9  ;;  %vm303_vm4 = vcmp.eq.f32.partialorder %v2468_v9, 0.0  ;;  %vm277_vm5 = vcmp.eq.f32.partialorder %v2470_v29, inf  ;;  %vm279_vm6 = vcmp.eq.f32.partialorder %v2470_v29, 0.0 }
  0xb2   : > { %1906 = vrsqrt.f32 %v2470_v29 }
  0xb4   : > { %932 = vadd.xlane.f32.xlu1 %v918_v30  ;;  %934 = vadd.xlane.f32.xlu2 %v919_v8 }
  0xb5   : > { %930 = vadd.xlane.f32.xlu0 %v917_v1 }
  0xb6   : > { %v1903_v46 = vpop.eup %1902 }
  0xb7   : > { %v2478_v2 = vpop.xlane.xlu2 %264  ;;  %v2480_v34 = vpop.xlane.xlu1 %260  ;;  %v319_v53 = vmul.f32 %v1903_v46, %v2466_v3 }
  0xb8   : > { %v2482_v35 = vpop.xlane.xlu0 %256  ;;  %v1905_v48 = vpop.eup %1904  ;;  %1908 = vrsqrt.f32 %v2478_v2  ;;  %vm337_vm7 = vcmp.eq.f32.partialorder %v2478_v2, inf  ;;  %vm313_vm8 = vcmp.eq.f32.partialorder %v2480_v34, inf  ;;  %vm339_vm10 = vcmp.eq.f32.partialorder %v2478_v2, 0.0 }
  0xb9   : > { %v1907_v52 = vpop.eup %1906  ;;  %1910 = vrsqrt.f32 %v2480_v34  ;;  %v295_v32 = vmul.f32 %v1905_v48, %v2468_v9  ;;  %v320_v60 = vmul.f32 %v1903_v46, %v319_v53  ;;  %vm289_vm9 = vcmp.eq.f32.partialorder %v2482_v35, inf }
  0xba   : > { %v271_v51 = vmul.f32 %v1907_v52, %v2470_v29  ;;  %1912 = vrsqrt.f32 %v2482_v35  ;;  %vm315_vm11 = vcmp.eq.f32.partialorder %v2480_v34, 0.0  ;;  %vm291_vm12 = vcmp.eq.f32.partialorder %v2482_v35, 0.0 }
  0xbb   : > { %v296_v63 = vmul.f32 %v1905_v48, %v295_v32  ;;  %v321_v49 = vmul.f32 0.5, %v320_v60 }
  0xbc   : > { %1106 = vadd.xlane.f32.xlu1 %v1097_v36  ;;  %1288 = vadd.xlane.f32.xlu2 %v1280_v15  ;;  %v272_v0 = vmul.f32 %v1907_v52, %v271_v51 }
  0xbd   : > { %1104 = vadd.xlane.f32.xlu0 %v1096_v14  ;;  %v297_v20 = vmul.f32 0.5, %v296_v63  ;;  %v322_v30 = vsub.f32 1.5, %v321_v49  ;;  %v304_v49 = vand.u32 2147483648, %v2468_v9 }
  0xbe   : > { %v2521_v59 = vpop.eup %1908  ;;  %v273_v39 = vmul.f32 0.5, %v272_v0 }
  0xbf   : > { %v2493_v7 = vpop.xlane.xlu2 %374  ;;  %v2495_v40 = vpop.xlane.xlu1 %268  ;;  %v331_v10 = vmul.f32 %v2521_v59, %v2478_v2  ;;  %v298_v8 = vsub.f32 1.5, %v297_v20  ;;  %v323_v38 = vmul.f32 %v1903_v46, %v322_v30  ;;  %v328_v46 = vand.u32 2147483648, %v2466_v3 }
  0xc0   : > { %v2497_v41 = vpop.xlane.xlu0 %266  ;;  %1914 = vrsqrt.f32 %v2493_v7  ;;  %v2526_v5 = vpop.eup %1910  ;;  %v274_v1 = vsub.f32 1.5, %v273_v39  ;;  %vm397_vm13 = vcmp.eq.f32.partialorder %v2493_v7, inf  ;;  %vm361_vm14 = vcmp.eq.f32.partialorder %v2495_v40, inf }
  0xc1   : > { %1916 = vrsqrt.f32 %v2495_v40  ;;  %v2529_v6 = vpop.eup %1912  ;;  %v307_v11 = vmul.f32 %v2526_v5, %v2480_v34  ;;  %v332_v36 = vmul.f32 %v2521_v59, %v331_v10  ;;  %v324_v63 = vmul.f32 %v323_v38, %v2466_v3 }
  0xc2   : > { %v283_v12 = vmul.f32 %v2529_v6, %v2482_v35  ;;  %1918 = vrsqrt.f32 %v2497_v41  ;;  %v275_v53 = vmul.f32 %v1907_v52, %v274_v1  ;;  %v340_v1 = vand.u32 2147483648, %v2478_v2 }
  0xc3   : > { %v308_v15 = vmul.f32 %v2526_v5, %v307_v11  ;;  %v333_v32 = vmul.f32 0.5, %v332_v36  ;;  %vm399_vm15 = vcmp.eq.f32.partialorder %v2493_v7, 0.0  ;;  %vm363_vm0 = vcmp.eq.f32.partialorder %v2495_v40, 0.0 }
  0xc4   : > { %1472 = vadd.xlane.f32.xlu1 %v1464_v42  ;;  %1474 = vadd.xlane.f32.xlu2 %v1465_v13  ;;  %v284_v14 = vmul.f32 %v2529_v6, %v283_v12  ;;  %v276_v20 = vmul.f32 %v275_v53, %v2470_v29 }
  0xc5   : > { %1290 = vadd.xlane.f32.xlu0 %v1281_v47  ;;  %v299_v47 = vmul.f32 %v1905_v48, %v298_v8  ;;  %v309_v51 = vmul.f32 0.5, %v308_v15  ;;  %v334_v39 = vsub.f32 1.5, %v333_v32  ;;  %v280_v8 = vand.u32 2147483648, %v2470_v29 }
  0xc6   : > { %v2540_v17 = vpop.eup %1914 }
  0xc7   : > { %v2511_v31 = vpop.xlane.xlu2 %380  ;;  %v2513_v21 = vpop.xlane.xlu1 %378  ;;  %v391_v42 = vmul.f32 %v2540_v17, %v2493_v7  ;;  %v300_v0 = vmul.f32 %v299_v47, %v2468_v9  ;;  %v310_v10 = vsub.f32 1.5, %v309_v51  ;;  %v335_v32 = vmul.f32 %v2521_v59, %v334_v39 }
  0xc8   : > { %v2524_v4 = vpop.xlane.xlu0 %376  ;;  %v2544_v22 = vpop.eup %1916  ;;  %1920 = vrsqrt.f32 %v2511_v31 }
  0xc9   : > { %v355_v13 = vmul.f32 %v2544_v22, %v2495_v40  ;;  %v2562_v19 = vpop.eup %1918  ;;  %1922 = vrsqrt.f32 %v2513_v21  ;;  %v311_v51 = vmul.f32 %v2526_v5, %v310_v10 }
  0xca   : > { %v343_v60 = vmul.f32 %v2562_v19, %v2497_v41  ;;  %1924 = vrsqrt.f32 %v2524_v4 }
  0xcc   : > { %1292 = vadd.xlane.f32.xlu1 %v1282_v50  ;;  %1476 = vadd.xlane.f32.xlu2 %v1466_v54  ;;  %v285_v50 = vmul.f32 0.5, %v284_v14  ;;  %v392_v54 = vmul.f32 %v2540_v17, %v391_v42  ;;  %v326_v14 = vsel %vm325_vm1, %v2466_v3, %v324_v63  ;;  %v302_v42 = vsel %vm301_vm3, %v2468_v9, %v300_v0 }
  0xcd   : > { %1108 = vadd.xlane.f32.xlu0 %v1098_v58  ;;  %v356_v58 = vmul.f32 %v2544_v22, %v355_v13  ;;  %v278_v13 = vsel %vm277_vm5, %v2470_v29, %v276_v20  ;;  %v400_v20 = vand.u32 2147483648, %v2493_v7  ;;  %v2632_v39 = vsel %vm303_vm4, %v304_v49, %v302_v42 }
  0xce   : > { %v2578_v52 = vpop.eup %1920  ;;  %v286_v11 = vsub.f32 1.5, %v285_v50  ;;  %v2636_v10 = vsel %vm279_vm6, %v280_v8, %v278_v13  ;;  %v336_v3 = vmul.f32 %v335_v32, %v2478_v2  ;;  %v364_v49 = vand.u32 2147483648, %v2495_v40 }
  0xcf   : > { %v2538_v16 = vpop.xlane.xlu2 %386  ;;  %v2546_v23 = vpop.xlane.xlu1 %384  ;;  %v427_v36 = vmul.f32 %v2578_v52, %v2511_v31  ;;  %vm349_vm1 = vcmp.eq.f32.partialorder %v2497_v41, inf  ;;  %vm351_vm3 = vcmp.eq.f32.partialorder %v2497_v41, 0.0  ;;  %vm435_vm4 = vcmp.eq.f32.partialorder %v2511_v31, 0.0 }
  0xd0   : > { %v2560_v57 = vpop.xlane.xlu0 %382  ;;  %1926 = vrsqrt.f32 %v2538_v16  ;;  %v2589_v30 = vpop.eup %1922  ;;  %v287_v50 = vmul.f32 %v2529_v6, %v286_v11  ;;  %v2628_v6 = vsel %vm327_vm2, %v328_v46, %v326_v14  ;;  %v312_v46 = vmul.f32 %v311_v51, %v2480_v34 }
  0xd1   : > { %1928 = vrsqrt.f32 %v2546_v23  ;;  %v2596_v15 = vpop.eup %1924  ;;  %v428_v38 = vmul.f32 %v2578_v52, %v427_v36  ;;  %v415_v59 = vmul.f32 %v2589_v30, %v2513_v21  ;;  %v1468_v51 = vmul.f32 %v2419_v56, %v2371_v37 }
  0xd2   : > { %1930 = vrsqrt.f32 %v2560_v57  ;;  %v403_v5 = vmul.f32 %v2596_v15, %v2524_v4  ;;  %v288_v9 = vmul.f32 %v287_v50, %v2482_v35  ;;  %v1100_v50 = vmul.f32 %v2371_v37, %v2347_v27 }
  0xd3   : > { %v429_v14 = vmul.f32 0.5, %v428_v38  ;;  %v416_v42 = vmul.f32 %v2589_v30, %v415_v59  ;;  %v338_v38 = vsel %vm337_vm7, %v2478_v2, %v336_v3  ;;  %vm433_vm2 = vcmp.eq.f32.partialorder %v2511_v31, inf }
  0xd4   : > { %1294 = vadd.xlane.f32.xlu1 %v1283_v18  ;;  %1478 = vadd.xlane.f32.xlu2 %v1467_v24  ;;  %v393_v18 = vmul.f32 0.5, %v392_v54  ;;  %v357_v24 = vmul.f32 0.5, %v356_v58  ;;  %v292_v54 = vand.u32 2147483648, %v2482_v35  ;;  %v404_v13 = vmul.f32 %v2596_v15, %v403_v5 }
  0xd5   : > { %1110 = vadd.xlane.f32.xlu0 %v1099_v28  ;;  %v344_v28 = vmul.f32 %v2562_v19, %v343_v60  ;;  %v430_v3 = vsub.f32 1.5, %v429_v14  ;;  %v424_v14 = vand.u32 2147483648, %v2513_v21  ;;  %v412_v2 = vand.u32 2147483648, %v2524_v4 }
  0xd6   : > { %v2610_v53 = vpop.eup %1926  ;;  %v394_v58 = vsub.f32 1.5, %v393_v18  ;;  %v358_v60 = vsub.f32 1.5, %v357_v24  ;;  %vm421_vm5 = vcmp.eq.f32.partialorder %v2513_v21, inf  ;;  %vm409_vm6 = vcmp.eq.f32.partialorder %v2524_v4, inf }
  0xd7   : > { %v2576_v48 = vpop.xlane.xlu2 %496  ;;  %v2585_v12 = vpop.xlane.xlu1 %494  ;;  %v345_v63 = vmul.f32 0.5, %v344_v28  ;;  %v463_v11 = vmul.f32 %v2610_v53, %v2538_v16  ;;  %vm469_vm7 = vcmp.eq.f32.partialorder %v2538_v16, inf }
  0xd8   : > { %v2608_v47 = vpop.xlane.xlu0 %388  ;;  %v2618_v0 = vpop.eup %1928  ;;  %v395_v18 = vmul.f32 %v2540_v17, %v394_v58  ;;  %v359_v24 = vmul.f32 %v2544_v22, %v358_v60  ;;  %1932 = vrsqrt.f32 %v2576_v48  ;;  %v1284_v22 = vmul.f32 %v2419_v56, %v2347_v27 }
  0xd9   : > { %v346_v28 = vsub.f32 1.5, %v345_v63  ;;  %v451_v8 = vmul.f32 %v2618_v0, %v2546_v23  ;;  %v2655_v36 = vpop.eup %1930  ;;  %v464_v32 = vmul.f32 %v2610_v53, %v463_v11  ;;  %v314_v58 = vsel %vm313_vm8, %v2480_v34, %v312_v46 }
  0xda   : > { %v352_v60 = vand.u32 2147483648, %v2497_v41  ;;  %1934 = vrsqrt.f32 %v2585_v12  ;;  %v290_v63 = vsel %vm289_vm9, %v2482_v35, %v288_v9  ;;  %v439_v37 = vmul.f32 %v2655_v36, %v2560_v57 }
  0xdb   : > { %v452_v27 = vmul.f32 %v2618_v0, %v451_v8  ;;  %1936 = vrsqrt.f32 %v2608_v47  ;;  %v396_v59 = vmul.f32 %v395_v18, %v2493_v7  ;;  %v360_v5 = vmul.f32 %v359_v24, %v2495_v40 }
  0xdc   : > { %1296 = vadd.xlane.f32.xlu1 %v1284_v22  ;;  %1480 = vadd.xlane.f32.xlu2 %v1468_v51  ;;  %v347_v11 = vmul.f32 %v2562_v19, %v346_v28  ;;  %v436_v46 = vand.u32 2147483648, %v2511_v31  ;;  %v417_v9 = vmul.f32 0.5, %v416_v42  ;;  %v405_v8 = vmul.f32 0.5, %v404_v13 }
  0xdd   : > { %1112 = vadd.xlane.f32.xlu0 %v1100_v50  ;;  %v465_v22 = vmul.f32 0.5, %v464_v32  ;;  %v2699_v18 = vsel %vm339_vm10, %v340_v1, %v338_v38  ;;  %v4118_v24 = vand.u32 2147483648, %v2480_v34  ;;  %v2711_v28 = vsel %vm291_vm12, %v292_v54, %v290_v63 }
  0xde   : > { %v2693_v51 = vpop.eup %1932  ;;  %v453_v1 = vmul.f32 0.5, %v452_v27  ;;  %v440_v42 = vmul.f32 %v2655_v36, %v439_v37  ;;  %v398_v13 = vsel %vm397_vm13, %v2493_v7, %v396_v59  ;;  %v362_v35 = vsel %vm361_vm14, %v2495_v40, %v360_v5 }
  0xdf   : > { %v2647_v29 = vpop.xlane.xlu2 %502  ;;  %v2660_v17 = vpop.xlane.xlu1 %500  ;;  %v2705_v19 = vsel %vm315_vm11, %v4118_v24, %v314_v58  ;;  %v348_v54 = vmul.f32 %v347_v11, %v2497_v41  ;;  %v431_v32 = vmul.f32 %v2578_v52, %v430_v3  ;;  %v418_v58 = vsub.f32 1.5, %v417_v9 }
  0xe0   : > { %v2685_v56 = vpop.xlane.xlu0 %498  ;;  %1938 = vrsqrt.f32 %v2647_v29  ;;  %v2718_v34 = vpop.eup %1934  ;;  %v406_v63 = vsub.f32 1.5, %v405_v8  ;;  %v466_v27 = vsub.f32 1.5, %v465_v22  ;;  %v1285_v37 = vmul.f32 %v2416_v55, %v2344_v26 }
  0xe1   : > { %v2730_v38 = vpop.eup %1936  ;;  %v523_v59 = vmul.f32 %v2693_v51, %v2576_v48  ;;  %1940 = vrsqrt.f32 %v2660_v17  ;;  %v1469_v52 = vmul.f32 %v2416_v55, %v2392_v45  ;;  %v1101_v5 = vmul.f32 %v2392_v45, %v2344_v26 }
  0xe2   : > { %v454_v3 = vsub.f32 1.5, %v453_v1  ;;  %v441_v9 = vmul.f32 0.5, %v440_v42  ;;  %v511_v8 = vmul.f32 %v2718_v34, %v2585_v12  ;;  %1942 = vrsqrt.f32 %v2685_v56 }
  0xe3   : > { %v2751_v22 = vsel %vm399_vm15, %v400_v20, %v398_v13  ;;  %v432_v55 = vmul.f32 %v431_v32, %v2511_v31  ;;  %v472_v26 = vand.u32 2147483648, %v2538_v16  ;;  %v475_v45 = vmul.f32 %v2730_v38, %v2608_v47 }
  0xe4   : > { %1298 = vadd.xlane.f32.xlu1 %v1285_v37  ;;  %1482 = vadd.xlane.f32.xlu2 %v1469_v52  ;;  %v2765_v7 = vsel %vm363_vm0, %v364_v49, %v362_v35  ;;  %v419_v20 = vmul.f32 %v2589_v30, %v418_v58  ;;  %v407_v1 = vmul.f32 %v2596_v15, %v406_v63  ;;  %v460_v42 = vand.u32 2147483648, %v2546_v23 }
  0xe5   : > { %1114 = vadd.xlane.f32.xlu0 %v1101_v5  ;;  %v350_v32 = vsel %vm349_vm1, %v2497_v41, %v348_v54  ;;  %v467_v40 = vmul.f32 %v2610_v53, %v466_v27  ;;  %vm457_vm8 = vcmp.eq.f32.partialorder %v2546_v23, inf  ;;  %v448_v30 = vand.u32 2147483648, %v2560_v57 }
  0xe6   : > { %v2759_v24 = vpop.eup %1938  ;;  %v524_v15 = vmul.f32 %v2693_v51, %v523_v59  ;;  %v455_v49 = vmul.f32 %v2618_v0, %v454_v3  ;;  %v442_v35 = vsub.f32 1.5, %v441_v9  ;;  %v512_v58 = vmul.f32 %v2718_v34, %v511_v8 }
  0xe7   : > { %v2728_v50 = vpop.xlane.xlu2 %508  ;;  %v2742_v11 = vpop.xlane.xlu1 %506  ;;  %v434_v54 = vsel %vm433_vm2, %v2511_v31, %v432_v55  ;;  %vm423_vm9 = vcmp.eq.f32.partialorder %v2513_v21, 0.0  ;;  %vm411_vm10 = vcmp.eq.f32.partialorder %v2524_v4, 0.0  ;;  %v476_v53 = vmul.f32 %v2730_v38, %v475_v45 }
  0xe8   : > { %v2772_v13 = vpop.xlane.xlu0 %504  ;;  %1944 = vrsqrt.f32 %v2728_v50  ;;  %v2784_v63 = vpop.eup %1940  ;;  %v559_v0 = vmul.f32 %v2759_v24, %v2647_v29  ;;  %v420_v37 = vmul.f32 %v419_v20, %v2513_v21  ;;  %v408_v59 = vmul.f32 %v407_v1, %v2524_v4 }
  0xe9   : > { %1946 = vrsqrt.f32 %v2742_v11  ;;  %v2795_v27 = vpop.eup %1942  ;;  %v1286_v52 = vmul.f32 %v2434_v62, %v2341_v25  ;;  %v468_v5 = vmul.f32 %v467_v40, %v2538_v16  ;;  %vm471_vm11 = vcmp.eq.f32.partialorder %v2538_v16, 0.0 }
  0xea   : > { %1948 = vrsqrt.f32 %v2772_v13  ;;  %vm459_vm12 = vcmp.eq.f32.partialorder %v2546_v23, 0.0  ;;  %vm445_vm13 = vcmp.eq.f32.partialorder %v2560_v57, inf  ;;  %v525_v3 = vmul.f32 0.5, %v524_v15 }
  0xeb   : > { %v1470_v9 = vmul.f32 %v2434_v62, %v2389_v44  ;;  %v1102_v8 = vmul.f32 %v2389_v44, %v2341_v25  ;;  %v2816_v45 = vsel %vm351_vm3, %v352_v60, %v350_v32  ;;  %v456_v20 = vmul.f32 %v455_v49, %v2546_v23 }
  0xec   : > { %v443_v1 = vmul.f32 %v2655_v36, %v442_v35  ;;  %v513_v40 = vmul.f32 0.5, %v512_v58  ;;  %1300 = vadd.xlane.f32.xlu1 %v1286_v52  ;;  %v477_v15 = vmul.f32 0.5, %v476_v53  ;;  %v560_v62 = vmul.f32 %v2759_v24, %v559_v0 }
  0xed   : > { %v547_v25 = vmul.f32 %v2784_v63, %v2660_v17  ;;  %v535_v44 = vmul.f32 %v2795_v27, %v2685_v56  ;;  %1484 = vadd.xlane.f32.xlu2 %v1470_v9  ;;  %1116 = vadd.xlane.f32.xlu0 %v1102_v8  ;;  %v2833_v36 = vsel %vm435_vm4, %v436_v46, %v434_v54  ;;  %vm447_vm14 = vcmp.eq.f32.partialorder %v2560_v57, 0.0 }
  0xee   : > { %v2827_v60 = vpop.eup %1944  ;;  %v422_v32 = vsel %vm421_vm5, %v2513_v21, %v420_v37  ;;  %v532_v49 = vand.u32 2147483648, %v2576_v48  ;;  %v410_v58 = vsel %vm409_vm6, %v2524_v4, %v408_v59  ;;  %v470_v31 = vsel %vm469_vm7, %v2538_v16, %v468_v5 }
  0xef   : > { %v2810_v55 = vpop.xlane.xlu2 %618  ;;  %v2825_v41 = vpop.xlane.xlu1 %616  ;;  %v526_v46 = vsub.f32 1.5, %v525_v3  ;;  %v458_v0 = vsel %vm457_vm8, %v2546_v23, %v456_v20  ;;  %v444_v37 = vmul.f32 %v443_v1, %v2560_v57  ;;  %v514_v52 = vsub.f32 1.5, %v513_v40 }
  0xf0   : > { %1950 = vrsqrt.f32 %v2810_v55  ;;  %v2841_v35 = vpop.eup %1946  ;;  %v2857_v9 = vpop.xlane.xlu0 %614  ;;  %v478_v59 = vsub.f32 1.5, %v477_v15  ;;  %v561_v8 = vmul.f32 0.5, %v560_v62  ;;  %v548_v5 = vmul.f32 %v2784_v63, %v547_v25 }
  0xf1   : > { %v2850_v53 = vpop.eup %1948  ;;  %1952 = vrsqrt.f32 %v2825_v41  ;;  %v536_v3 = vmul.f32 %v2795_v27, %v535_v44  ;;  %v2865_v54 = vsel %vm423_vm9, %v424_v14, %v422_v32  ;;  %v2871_v20 = vsel %vm411_vm10, %v412_v2, %v410_v58 }
  0xf2   : > { %v595_v1 = vmul.f32 %v2827_v60, %v2728_v50  ;;  %v583_v40 = vmul.f32 %v2841_v35, %v2742_v11  ;;  %v527_v15 = vmul.f32 %v2693_v51, %v526_v46  ;;  %vm529_vm15 = vcmp.eq.f32.partialorder %v2576_v48, inf }
  0xf3   : > { %vm517_vm0 = vcmp.eq.f32.partialorder %v2585_v12, inf  ;;  %v484_v21 = vand.u32 2147483648, %v2608_v47  ;;  %v571_v14 = vmul.f32 %v2850_v53, %v2772_v13  ;;  %1954 = vrsqrt.f32 %v2857_v9 }
  0xf4   : > { %v2890_v2 = vsel %vm471_vm11, %v472_v26, %v470_v31  ;;  %v2896_v51 = vsel %vm459_vm12, %v460_v42, %v458_v0  ;;  %v446_v62 = vsel %vm445_vm13, %v2560_v57, %v444_v37  ;;  %v515_v25 = vmul.f32 %v2718_v34, %v514_v52 }
  0xf5   : > { %4119 = vst [vmem:[#allocation20_spill] sm:$0xff] %v2890_v2  ;;  %vm481_vm1 = vcmp.eq.f32.partialorder %v2608_v47, inf  ;;  %v479_v44 = vmul.f32 %v2730_v38, %v478_v59  ;;  %v562_v32 = vsub.f32 1.5, %v561_v8  ;;  %v549_v16 = vmul.f32 0.5, %v548_v5 }
  0xf6   : > { %v2884_v4 = vpop.eup %1950  ;;  %4120 = vst [vmem:[#allocation21_spill] sm:$0xff] %v2896_v51  ;;  %v537_v26 = vmul.f32 0.5, %v536_v3  ;;  %vm531_vm2 = vcmp.eq.f32.partialorder %v2576_v48, 0.0  ;;  %v596_v23 = vmul.f32 %v2827_v60, %v595_v1  ;;  %v584_v42 = vmul.f32 %v2841_v35, %v583_v40 }
  0xf7   : > { %v2904_v58 = vpop.eup %1952  ;;  %v1287_v31 = vmul.f32 %v2431_v61, %v2362_v33  ;;  %v1471_v34 = vmul.f32 %v2431_v61, %v2386_v43  ;;  %v2917_v38 = vsel %vm447_vm14, %v448_v30, %v446_v62  ;;  %v528_v46 = vmul.f32 %v527_v15, %v2576_v48  ;;  %v2925_v52 = vpop.xlane.xlu1 %622 }
  0xf8   : > { %4121 = vst [vmem:[#allocation22_spill] sm:$0xff] %v2917_v38  ;;  %vm519_vm3 = vcmp.eq.f32.partialorder %v2585_v12, 0.0  ;;  %vm483_vm4 = vcmp.eq.f32.partialorder %v2608_v47, 0.0  ;;  %v572_v0 = vmul.f32 %v2850_v53, %v571_v14  ;;  %v655_v37 = vmul.f32 %v2884_v4, %v2810_v55  ;;  %v2934_v8 = vpop.xlane.xlu2 %624 }
  0xf9   : > { %v516_v61 = vmul.f32 %v515_v25, %v2585_v12  ;;  %vm565_vm5 = vcmp.eq.f32.partialorder %v2647_v29, inf  ;;  %v568_v57 = vand.u32 2147483648, %v2647_v29  ;;  %v643_v30 = vmul.f32 %v2904_v58, %v2825_v41  ;;  %1302 = vadd.xlane.f32.xlu1 %v1287_v31  ;;  %1486 = vadd.xlane.f32.xlu2 %v1471_v34  ;;  %v2936_v5 = vpop.eup %1954  ;;  %v2943_v31 = vpop.xlane.xlu0 %620 }
  0xfa   : > { %v1103_v59 = vmul.f32 %v2386_v43, %v2362_v33  ;;  %v480_v3 = vmul.f32 %v479_v44, %v2608_v47  ;;  %v563_v1 = vmul.f32 %v2759_v24, %v562_v32  ;;  %v550_v40 = vsub.f32 1.5, %v549_v16 }
  0xfb   : > { %v538_v15 = vsub.f32 1.5, %v537_v26  ;;  %v597_v14 = vmul.f32 0.5, %v596_v23  ;;  %v585_v62 = vmul.f32 0.5, %v584_v42  ;;  %v631_v25 = vmul.f32 %v2936_v5, %v2857_v9 }
  0xfc   : > { %1118 = vadd.xlane.f32.xlu0 %v1103_v59  ;;  %1956 = vrsqrt.f32 %v2925_v52  ;;  %v556_v33 = vand.u32 2147483648, %v2660_v17  ;;  %v573_v43 = vmul.f32 0.5, %v572_v0  ;;  %v656_v34 = vmul.f32 %v2884_v4, %v655_v37 }
  0xfd   : > { %1958 = vrsqrt.f32 %v2934_v8  ;;  %v530_v24 = vsel %vm529_vm15, %v2576_v48, %v528_v46  ;;  %v518_v44 = vsel %vm517_vm0, %v2585_v12, %v516_v61  ;;  %vm567_vm6 = vcmp.eq.f32.partialorder %v2647_v29, 0.0 }
  0xfe   : > { %vm553_vm7 = vcmp.eq.f32.partialorder %v2660_v17, inf  ;;  %v544_v32 = vand.u32 2147483648, %v2685_v56  ;;  %v644_v16 = vmul.f32 %v2904_v58, %v643_v30  ;;  %v482_v26 = vsel %vm481_vm1, %v2608_v47, %v480_v3 }
  0xff   : > { %v564_v23 = vmul.f32 %v563_v1, %v2647_v29  ;;  %v551_v42 = vmul.f32 %v2784_v63, %v550_v40  ;;  %vm541_vm8 = vcmp.eq.f32.partialorder %v2685_v56, inf  ;;  %1960 = vrsqrt.f32 %v2943_v31 }
 0x100   : > { %v539_v46 = vmul.f32 %v2795_v27, %v538_v15  ;;  %v598_v0 = vsub.f32 1.5, %v597_v14  ;;  %v586_v37 = vsub.f32 1.5, %v585_v62  ;;  %v632_v61 = vmul.f32 %v2936_v5, %v631_v25 }
 0x101   : > { %v2971_v30 = vsel %vm531_vm2, %v532_v49, %v530_v24  ;;  %v604_v59 = vand.u32 2147483648, %v2728_v50  ;;  %v574_v3 = vsub.f32 1.5, %v573_v43  ;;  %v657_v63 = vmul.f32 0.5, %v656_v34 }
 0x102   : > { %v2974_v1 = vpop.eup %1956  ;;  %v4122_v40 = vand.u32 2147483648, %v2585_v12  ;;  %v2986_v15 = vsel %vm483_vm4, %v484_v21, %v482_v26  ;;  %vm555_vm9 = vcmp.eq.f32.partialorder %v2660_v17, 0.0  ;;  %vm543_vm10 = vcmp.eq.f32.partialorder %v2685_v56, 0.0 }
 0x103   : > { %4123 = vst [vmem:[#allocation23_spill] sm:$0xff] %v2986_v15  ;;  %v592_v48 = vand.u32 2147483648, %v2742_v11  ;;  %v645_v49 = vmul.f32 0.5, %v644_v16  ;;  %v2991_v14 = vpop.eup %1958  ;;  %v566_v12 = vsel %vm565_vm5, %v2647_v29, %v564_v23  ;;  %v552_v62 = vmul.f32 %v551_v42, %v2660_v17 }
 0x104   : > { %v2980_v27 = vsel %vm519_vm3, %v4122_v40, %v518_v44  ;;  %vm601_vm11 = vcmp.eq.f32.partialorder %v2728_v50, inf  ;;  %v679_v47 = vmul.f32 %v2974_v1, %v2925_v52  ;;  %v751_v21 = vmul.f32 %v2751_v22, %v2636_v10 }
 0x105   : > { %v540_v25 = vmul.f32 %v539_v46, %v2685_v56  ;;  %v599_v43 = vmul.f32 %v2827_v60, %v598_v0  ;;  %v587_v34 = vmul.f32 %v2841_v35, %v586_v37  ;;  %vm589_vm12 = vcmp.eq.f32.partialorder %v2742_v11, inf  ;;  %v3007_v44 = vpop.eup %1960  ;;  %v3019_v37 = vpop.xlane.xlu1 %628 }
 0x106   : > { %vm577_vm13 = vcmp.eq.f32.partialorder %v2772_v13, inf  ;;  %v633_v24 = vmul.f32 0.5, %v632_v61  ;;  %v575_v16 = vmul.f32 %v2850_v53, %v574_v3  ;;  %v580_v26 = vand.u32 2147483648, %v2772_v13  ;;  %4124 = vst [vmem:[#allocation24_spill] sm:$0xff] %v3019_v37 }
 0x107   : > { %v658_v23 = vsub.f32 1.5, %v657_v63  ;;  %v3011_v42 = vadd.f32 1e-08, %v751_v21  ;;  %vm603_vm14 = vcmp.eq.f32.partialorder %v2728_v50, 0.0  ;;  %v664_v60 = vand.u32 2147483648, %v2810_v55  ;;  %v3033_v63 = vpop.xlane.xlu0 %626 }
 0x108   : > { %v646_v46 = vsub.f32 1.5, %v645_v49  ;;  %v691_v35 = vmul.f32 %v2991_v14, %v2934_v8  ;;  %v667_v0 = vmul.f32 %v3007_v44, %v2943_v31  ;;  %v3025_v53 = vsel %vm567_vm6, %v568_v57, %v566_v12  ;;  %4125 = vst [vmem:[#allocation25_spill] sm:$0xff] %v3033_v63 }
 0x109   : > { %v554_v61 = vsel %vm553_vm7, %v2660_v17, %v552_v62  ;;  %vm591_vm15 = vcmp.eq.f32.partialorder %v2742_v11, 0.0  ;;  %v680_v3 = vmul.f32 %v2974_v1, %v679_v47  ;;  %1962 = vrcp.f32 %v3011_v42 }
 0x10a   : > { %v542_v40 = vsel %vm541_vm8, %v2685_v56, %v540_v25  ;;  %v600_v29 = vmul.f32 %v599_v43, %v2728_v50  ;;  %v588_v57 = vmul.f32 %v587_v34, %v2742_v11  ;;  %vm579_vm0 = vcmp.eq.f32.partialorder %v2772_v13, 0.0 }
 0x10b   : > { %vm661_vm1 = vcmp.eq.f32.partialorder %v2810_v55, inf  ;;  %v634_v49 = vsub.f32 1.5, %v633_v24  ;;  %v576_v12 = vmul.f32 %v575_v16, %v2772_v13  ;;  %v659_v62 = vmul.f32 %v2884_v4, %v658_v23 }
 0x10c   : > { %vm649_vm2 = vcmp.eq.f32.partialorder %v2825_v41, inf  ;;  %v668_v47 = vmul.f32 %v3007_v44, %v667_v0  ;;  %1964 = vrsqrt.f32 %v3019_v37  ;;  %v647_v21 = vmul.f32 %v2904_v58, %v646_v46 }
 0x10d   : > { %v692_v25 = vmul.f32 %v2991_v14, %v691_v35  ;;  %1966 = vrsqrt.f32 %v3033_v63  ;;  %v753_v43 = vmul.f32 %v2865_v54, %v2632_v39  ;;  %v3056_v4 = vsel %vm555_vm9, %v556_v33, %v554_v61 }
 0x10e   : > { %v3062_v34 = vsel %vm543_vm10, %v544_v32, %v542_v40  ;;  %vm663_vm3 = vcmp.eq.f32.partialorder %v2810_v55, 0.0  ;;  %v652_v58 = vand.u32 2147483648, %v2825_v41  ;;  %v681_v24 = vmul.f32 0.5, %v680_v3 }
 0x10f   : > { %v602_v16 = vsel %vm601_vm11, %v2728_v50, %v600_v29  ;;  %vm651_vm4 = vcmp.eq.f32.partialorder %v2825_v41, 0.0  ;;  %v635_v17 = vmul.f32 %v2936_v5, %v634_v49  ;;  %vm637_vm5 = vcmp.eq.f32.partialorder %v2857_v9, inf  ;;  %v3074_v56 = vpop.eup %1962 }
 0x110   : > { %v3072_v33 = vadd.f32 1e-08, %v753_v43  ;;  %v590_v32 = vsel %vm589_vm12, %v2742_v11, %v588_v57  ;;  %v578_v23 = vsel %vm577_vm13, %v2772_v13, %v576_v12  ;;  %v660_v46 = vmul.f32 %v659_v62, %v2810_v55 }
 0x111   : > { %v669_v35 = vmul.f32 0.5, %v668_v47  ;;  %v648_v0 = vmul.f32 %v647_v21, %v2825_v41  ;;  %vm639_vm6 = vcmp.eq.f32.partialorder %v2857_v9, 0.0  ;;  %v693_v5 = vmul.f32 0.5, %v692_v25 }
 0x112   : > { %v768_v61 = vmul.f32 %v3074_v56, %v3011_v42  ;;  %v754_v3 = vmul.f32 %v2833_v36, %v2705_v19  ;;  %v3089_v40 = vpop.eup %1964  ;;  %v3095_v29 = vsel %vm603_vm14, %v604_v59, %v602_v16  ;;  %v640_v57 = vand.u32 2147483648, %v2857_v9 }
 0x113   : > { %4126 = vst [vmem:[#allocation26_spill] sm:$0xff] %v3089_v40  ;;  %v682_v49 = vsub.f32 1.5, %v681_v24  ;;  %1968 = vrcp.f32 %v3072_v33  ;;  %v3099_v12 = vpop.eup %1966  ;;  %v3105_v62 = vsel %vm591_vm15, %v592_v48, %v590_v32  ;;  %v636_v47 = vmul.f32 %v635_v17, %v2857_v9 }
 0x114   : > { %4127 = vst [vmem:[#allocation27_spill] sm:$0xff] %v3099_v12  ;;  %v769_v50 = vsub.f32 1.0, %v768_v61  ;;  %v3111_v59 = vsel %vm579_vm0, %v580_v26, %v578_v23  ;;  %v662_v25 = vsel %vm661_vm1, %v2810_v55, %v660_v46  ;;  %v670_v24 = vsub.f32 1.5, %v669_v35 }
 0x115   : > { %v650_v11 = vsel %vm649_vm2, %v2825_v41, %v648_v0  ;;  %v694_v48 = vsub.f32 1.5, %v693_v5  ;;  %vm685_vm7 = vcmp.eq.f32.partialorder %v2925_v52, inf  ;;  %v3121_v16 = vadd.f32 1e-08, %v754_v3 }
 0x116   : > { %v752_v13 = vmul.f32 %v2871_v20, %v2711_v28  ;;  %v683_v26 = vmul.f32 %v2974_v1, %v682_v49  ;;  %v715_v32 = vmul.f32 %v3089_v40, %v3019_v37  ;;  %v703_v23 = vmul.f32 %v3099_v12, %v3033_v63 }
 0x117   : > { %v3135_v46 = vsel %vm663_vm3, %v664_v60, %v662_v25  ;;  %v638_v35 = vsel %vm637_vm5, %v2857_v9, %v636_v47  ;;  %vm673_vm8 = vcmp.eq.f32.partialorder %v2943_v31, inf  ;;  %v770_v1 = vmul.f32 %v3074_v56, %v769_v50 }
 0x118   : > { %1970 = vrcp.f32 %v3121_v16  ;;  %v3147_v5 = vsel %vm651_vm4, %v652_v58, %v650_v11  ;;  %v671_v55 = vmul.f32 %v3007_v44, %v670_v24  ;;  %vm772_vm9 = vweird.f32 %v3011_v42 }
 0x119   : > { %v3143_v0 = vpop.eup %1968  ;;  %v776_v60 = vand.u32 2147483647, %v3011_v42  ;;  %v695_v61 = vmul.f32 %v2991_v14, %v694_v48  ;;  %v778_v3 = vand.u32 2147483648, %v3011_v42  ;;  %v3156_v47 = vadd.f32 1e-08, %v752_v13 }
 0x11a   : > { %v796_v49 = vmul.f32 %v3143_v0, %v3072_v33  ;;  %v3160_v41 = vsel %vm639_vm6, %v640_v57, %v638_v35  ;;  %v684_v58 = vmul.f32 %v683_v26, %v2925_v52  ;;  %v3164_v44 = vmul.f32 %v3089_v40, %v715_v32 }
 0x11b   : > { %v704_v50 = vmul.f32 %v3099_v12, %v703_v23  ;;  %v771_v14 = vadd.f32 %v3074_v56, %v770_v1  ;;  %vm773_vm10 = vweird.f32 %v3074_v56  ;;  %1972 = vrcp.f32 %v3156_v47 }
 0x11c   : > { %v797_v25 = vsub.f32 1.0, %v796_v49  ;;  %v672_v24 = vmul.f32 %v671_v55, %v2943_v31  ;;  %vm3171_vm11 = vcmp.eq.f32.partialorder %v776_v60, 8.507059e+37  ;;  %v804_v57 = vand.u32 2147483647, %v3072_v33  ;;  %vm3194_vm12 = vmor %vm772_vm9, %vm773_vm10 }
 0x11d   : > { %v756_v11 = vmul.f32 %v2896_v51, %v2699_v18  ;;  %v3181_v13 = vmul.f32 %v695_v61, %v2934_v8  ;;  %v779_v26 = vor.u32 1.1754944e-38, %v778_v3  ;;  %v757_v32 = vmul.f32 %v2890_v2, %v2816_v45 }
 0x11e   : > { %v3178_v48 = vpop.eup %1970  ;;  %v755_v23 = vmul.f32 %v2917_v38, %v2628_v6  ;;  %v3190_v35 = vsel %vm685_vm7, %v2925_v52, %v684_v58  ;;  %v3198_v55 = vmul.f32 0.5, %v704_v50  ;;  %v798_v60 = vmul.f32 %v3143_v0, %v797_v25  ;;  %v736_v50 = vpop.xlane.xlu2 %735 }
 0x11f   : > { %v810_v61 = vmul.f32 %v3178_v48, %v3121_v16  ;;  %v775_v3 = vsel %vm3194_vm12, %v3074_v56, %v771_v14  ;;  %vm800_vm13 = vweird.f32 %v3072_v33  ;;  %v3207_v49 = vadd.f32 1e-08, %v756_v11 }
 0x120   : > { %4132 = vst [vmem:[#allocation28_spill] sm:$0xff] %v3198_v55  ;;  %v3209_v42 = vadd.f32 1e-08, %v757_v32  ;;  %v3214_v58 = vsel %vm673_vm8, %v2943_v31, %v672_v24  ;;  %vm3216_vm14 = vcmp.eq.f32.partialorder %v804_v57, 8.507059e+37  ;;  %v806_v21 = vand.u32 2147483648, %v3072_v33 }
 0x121   : > { %v811_v1 = vsub.f32 1.0, %v810_v61  ;;  %v1973_v56 = vpop.eup %1972  ;;  %v818_v14 = vand.u32 2147483647, %v3121_v16  ;;  %v820_v11 = vand.u32 2147483648, %v3121_v16  ;;  %1974 = vrcp.f32 %v3207_v49 }
 0x122   : > { %v3224_v32 = vadd.f32 1e-08, %v755_v23  ;;  %v780_v24 = vsel %vm3171_vm11, %v779_v26, %v775_v3  ;;  %v799_v57 = vadd.f32 %v3143_v0, %v798_v60  ;;  %vm801_vm15 = vweird.f32 %v3143_v0 }
 0x123   : > { %v782_v43 = vmul.f32 %v1973_v56, %v3156_v47  ;;  %v3231_v17 = vmul.f32 %v780_v24, %v736_v50  ;;  %v812_v61 = vmul.f32 %v3178_v48, %v811_v1  ;;  %v790_v2 = vand.u32 2147483647, %v3156_v47  ;;  %vm3240_vm1 = vmor %vm800_vm13, %vm801_vm15 }
 0x124   : > { %1976 = vrcp.f32 %v3209_v42  ;;  %v807_v63 = vor.u32 1.1754944e-38, %v806_v21  ;;  %vm814_vm0 = vweird.f32 %v3121_v16  ;;  %v792_v9 = vand.u32 2147483648, %v3156_v47 }
 0x125   : > { %v783_v23 = vsub.f32 1.0, %v782_v43  ;;  %vm3244_vm2 = vcmp.eq.f32.partialorder %v818_v14, 8.507059e+37  ;;  %v821_v3 = vor.u32 1.1754944e-38, %v820_v11  ;;  %1978 = vrcp.f32 %v3224_v32  ;;  %v740_v11 = vpop.xlane.xlu1 %739 }
 0x126   : > { %v936_v21 = vmul.f32 %v2980_v27, %v2636_v10  ;;  %v937_v43 = vmul.f32 %v2971_v30, %v2711_v28  ;;  %v803_v33 = vsel %vm3240_vm1, %v3143_v0, %v799_v57  ;;  %vm786_vm3 = vweird.f32 %v3156_v47 }
 0x127   : > { %v784_v50 = vmul.f32 %v1973_v56, %v783_v23  ;;  %vm787_vm4 = vweird.f32 %v1973_v56  ;;  %v3257_v1 = vpop.eup %1974  ;;  %v887_v14 = vsub.f32 1.0, %v3231_v17  ;;  %v813_v24 = vadd.f32 %v3178_v48, %v812_v61  ;;  %v738_v61 = vpop.xlane.xlu0 %737 }
 0x128   : > { %vm815_vm5 = vweird.f32 %v3178_v48  ;;  %vm3262_vm6 = vcmp.eq.f32.partialorder %v790_v2, 8.507059e+37  ;;  %v793_v26 = vor.u32 1.1754944e-38, %v792_v9  ;;  %v838_v0 = vmul.f32 %v3257_v1, %v3207_v49  ;;  %vm788_vm7 = vmor %vm786_vm3, %vm787_vm4 }
 0x129   : > { %v785_v28 = vadd.f32 %v1973_v56, %v784_v50  ;;  %v758_v47 = vmul.f32 %v2986_v15, %v2765_v7  ;;  %v808_v17 = vsel %vm3216_vm14, %v807_v63, %v803_v33  ;;  %vm842_vm8 = vweird.f32 %v3207_v49  ;;  %vm3284_vm9 = vmor %vm814_vm0, %vm815_vm5  ;;  %v742_v63 = vpop.xlane.xlu2 %741 }
 0x12a   : > { %v3270_v57 = vpop.eup %1976  ;;  %v846_v2 = vand.u32 2147483647, %v3207_v49  ;;  %v3276_v23 = vadd.f32 1e-08, %v936_v21  ;;  %v3278_v9 = vadd.f32 1e-08, %v937_v43  ;;  %v881_v50 = vmul.f32 %v808_v17, %v740_v11 }
 0x12b   : > { %v789_v25 = vsel %vm788_vm7, %v1973_v56, %v785_v28  ;;  %v839_v33 = vsub.f32 1.0, %v838_v0  ;;  %v852_v40 = vmul.f32 %v3270_v57, %v3209_v42  ;;  %v1979_v37 = vpop.eup %1978  ;;  %v817_v21 = vsel %vm3284_vm9, %v3178_v48, %v813_v24 }
 0x12c   : > { %v794_v43 = vsel %vm3262_vm6, %v793_v26, %v789_v25  ;;  %v848_v16 = vand.u32 2147483648, %v3207_v49  ;;  %1980 = vrcp.f32 %v3276_v23  ;;  %v824_v28 = vmul.f32 %v1979_v37, %v3224_v32 }
 0x12d   : > { %v880_v11 = vmul.f32 %v794_v43, %v738_v61  ;;  %v840_v17 = vmul.f32 %v3257_v1, %v839_v33  ;;  %v853_v56 = vsub.f32 1.0, %v852_v40  ;;  %vm3299_vm10 = vcmp.eq.f32.partialorder %v846_v2, 8.507059e+37  ;;  %v746_v49 = vpop.xlane.xlu1 %745 }
 0x12e   : > { %vm856_vm11 = vweird.f32 %v3209_v42  ;;  %v860_v15 = vand.u32 2147483647, %v3209_v42  ;;  %v862_v48 = vand.u32 2147483648, %v3209_v42  ;;  %v834_v24 = vand.u32 2147483648, %v3224_v32 }
 0x12f   : > { %1982 = vrcp.f32 %v3278_v9  ;;  %v889_v10 = vsub.f32 1.0, %v881_v50  ;;  %v822_v40 = vsel %vm3244_vm2, %v821_v3, %v817_v21  ;;  %v888_v26 = vsub.f32 1.0, %v880_v11 }
 0x130   : > { %v825_v61 = vsub.f32 1.0, %v824_v28  ;;  %v841_v2 = vadd.f32 %v3257_v1, %v840_v17  ;;  %vm843_vm12 = vweird.f32 %v3257_v1  ;;  %v854_v25 = vmul.f32 %v3270_v57, %v853_v56  ;;  %v744_v56 = vpop.xlane.xlu0 %743 }
 0x131   : > { %v832_v33 = vand.u32 2147483647, %v3224_v32  ;;  %v882_v43 = vmul.f32 %v822_v40, %v742_v63  ;;  %v895_v51 = vadd.f32 %v888_v26, %v887_v14  ;;  %vm829_vm13 = vweird.f32 %v1979_v37  ;;  %vm3319_vm15 = vmor %vm842_vm8, %vm843_vm12 }
 0x132   : > { %v826_v12 = vmul.f32 %v1979_v37, %v825_v61  ;;  %v3314_v38 = vpop.eup %1980  ;;  %v849_v50 = vor.u32 1.1754944e-38, %v848_v16  ;;  %v863_v55 = vor.u32 1.1754944e-38, %v862_v48  ;;  %vm828_vm14 = vweird.f32 %v3224_v32 }
 0x133   : > { %v835_v60 = vor.u32 1.1754944e-38, %v834_v24  ;;  %v896_v3 = vadd.f32 %v895_v51, %v889_v10  ;;  %vm3323_vm0 = vcmp.eq.f32.partialorder %v860_v15, 8.507059e+37  ;;  %v961_v63 = vand.u32 2147483647, %v3276_v23  ;;  %vm830_vm2 = vmor %vm828_vm14, %vm829_vm13 }
 0x134   : > { %v827_v14 = vadd.f32 %v1979_v37, %v826_v12  ;;  %v3328_v17 = vadd.f32 1e-08, %v758_v47  ;;  %v845_v51 = vsel %vm3319_vm15, %v3257_v1, %v841_v2  ;;  %v855_v32 = vadd.f32 %v3270_v57, %v854_v25  ;;  %v748_v47 = vpop.xlane.xlu2 %747 }
 0x135   : > { %v3330_v16 = vpop.eup %1982  ;;  %vm857_vm1 = vweird.f32 %v3270_v57  ;;  %v953_v12 = vmul.f32 %v3314_v38, %v3276_v23  ;;  %v890_v28 = vsub.f32 1.0, %v882_v43  ;;  %vm833_vm3 = vcmp.eq.f32.partialorder %v832_v33, 8.507059e+37 }
 0x136   : > { %v831_v15 = vsel %vm830_vm2, %v1979_v37, %v827_v14  ;;  %vm957_vm4 = vweird.f32 %v3276_v23  ;;  %v963_v1 = vand.u32 2147483648, %v3276_v23  ;;  %v967_v10 = vmul.f32 %v3330_v16, %v3278_v9  ;;  %vm3348_vm5 = vmor %vm856_vm11, %vm857_vm1 }
 0x137   : > { %v836_v48 = vsel %vm833_vm3, %v835_v60, %v831_v15  ;;  %v954_v24 = vsub.f32 1.0, %v953_v12  ;;  %v850_v40 = vsel %vm3299_vm10, %v849_v50, %v845_v51  ;;  %vm3352_vm6 = vcmp.eq.f32.partialorder %v961_v63, 8.507059e+37 }
 0x138   : > { %v883_v37 = vmul.f32 %v836_v48, %v744_v56  ;;  %v975_v2 = vand.u32 2147483647, %v3278_v9  ;;  %1984 = vrcp.f32 %v3328_v17  ;;  %v859_v0 = vsel %vm3348_vm5, %v3270_v57, %v855_v32 }
 0x139   : > { %v955_v25 = vmul.f32 %v3314_v38, %v954_v24  ;;  %vm958_vm7 = vweird.f32 %v3314_v38  ;;  %v968_v42 = vsub.f32 1.0, %v967_v10  ;;  %v897_v33 = vadd.f32 %v896_v3, %v890_v28 }
 0x13a   : > { %v891_v43 = vsub.f32 1.0, %v883_v37  ;;  %v939_v50 = vmul.f32 %v3056_v4, %v2705_v19  ;;  %v940_v60 = vmul.f32 %v3025_v53, %v2628_v6  ;;  %v884_v21 = vmul.f32 %v850_v40, %v746_v49  ;;  %vm3379_vm9 = vmor %vm957_vm4, %vm958_vm7 }
 0x13b   : > { %v956_v14 = vadd.f32 %v3314_v38, %v955_v25  ;;  %v969_v63 = vmul.f32 %v3330_v16, %v968_v42  ;;  %vm972_vm8 = vweird.f32 %v3330_v16  ;;  %v964_v51 = vor.u32 1.1754944e-38, %v963_v1 }
 0x13c   : > { %v898_v57 = vadd.f32 %v897_v33, %v891_v43  ;;  %v977_v32 = vand.u32 2147483648, %v3278_v9  ;;  %v3371_v56 = vadd.f32 1e-08, %v939_v50  ;;  %v864_v3 = vsel %vm3323_vm0, %v863_v55, %v859_v0  ;;  %v923_v24 = vpop.xlane.xlu2 %922 }
 0x13d   : > { %v970_v19 = vadd.f32 %v3330_v16, %v969_v63  ;;  %vm971_vm10 = vweird.f32 %v3278_v9  ;;  %v3385_v49 = vadd.f32 1e-08, %v940_v60  ;;  %v885_v28 = vmul.f32 %v864_v3, %v748_v47  ;;  %v921_v9 = vpop.xlane.xlu1 %920 }
 0x13e   : > { %v1985_v12 = vpop.eup %1984  ;;  %v960_v55 = vsel %vm3379_vm9, %v3314_v38, %v956_v14  ;;  %vm3390_vm11 = vmor %vm971_vm10, %vm972_vm8  ;;  %vm3394_vm12 = vcmp.eq.f32.partialorder %v975_v2, 8.507059e+37  ;;  %1986 = vrcp.f32 %v3371_v56  ;;  %v892_v15 = vsub.f32 1.0, %v884_v21 }
 0x13f   : > { %v974_v47 = vsel %vm3390_vm11, %v3330_v16, %v970_v19  ;;  %v866_v48 = vmul.f32 %v1985_v12, %v3328_v17  ;;  %v938_v38 = vmul.f32 %v3062_v34, %v2632_v39  ;;  %v978_v1 = vor.u32 1.1754944e-38, %v977_v32  ;;  %v750_v32 = vpop.xlane.xlu0 %749 }
 0x140   : > { %v874_v10 = vand.u32 2147483647, %v3328_v17  ;;  %v876_v40 = vand.u32 2147483648, %v3328_v17  ;;  %v942_v26 = vmul.f32 %v3105_v62, %v2816_v45  ;;  %v899_v37 = vadd.f32 %v898_v57, %v892_v15 }
 0x141   : > { %v965_v2 = vsel %vm3352_vm6, %v964_v51, %v960_v55  ;;  %v867_v0 = vsub.f32 1.0, %v866_v48  ;;  %1988 = vrcp.f32 %v3385_v49  ;;  %v893_v16 = vsub.f32 1.0, %v885_v28 }
 0x142   : > { %v1064_v25 = vmul.f32 %v965_v2, %v921_v9  ;;  %v979_v39 = vsel %vm3394_vm12, %v978_v1, %v974_v47  ;;  %v943_v42 = vmul.f32 %v3095_v29, %v2765_v7  ;;  %vm871_vm13 = vweird.f32 %v1985_v12 }
 0x143   : > { %v1065_v33 = vmul.f32 %v979_v39, %v923_v24  ;;  %v868_v43 = vmul.f32 %v1985_v12, %v867_v0  ;;  %v3416_v50 = vadd.f32 1e-08, %v938_v38  ;;  %vm870_vm14 = vweird.f32 %v3328_v17 }
 0x144   : > { %v3418_v45 = vpop.eup %1986  ;;  %vm3421_vm15 = vcmp.eq.f32.partialorder %v874_v10, 8.507059e+37  ;;  %v877_v60 = vor.u32 1.1754944e-38, %v876_v40  ;;  %v3425_v21 = vadd.f32 1e-08, %v942_v26  ;;  %v900_v63 = vadd.f32 %v899_v37, %v893_v16  ;;  %vm872_vm0 = vmor %vm870_vm14, %vm871_vm13 }
 0x145   : > { %v869_v14 = vadd.f32 %v1985_v12, %v868_v43  ;;  %v995_v7 = vmul.f32 %v3418_v45, %v3371_v56  ;;  %v1005_v57 = vand.u32 2147483648, %v3371_v56  ;;  %v1072_v51 = vsub.f32 1.0, %v1064_v25 }
 0x146   : > { %vm999_vm1 = vweird.f32 %v3371_v56  ;;  %v1003_v17 = vand.u32 2147483647, %v3371_v56  ;;  %1990 = vrcp.f32 %v3416_v50  ;;  %v3433_v3 = vadd.f32 1e-08, %v943_v42 }
 0x147   : > { %v3435_v6 = vpop.eup %1988  ;;  %v1073_v19 = vsub.f32 1.0, %v1065_v33  ;;  %v873_v28 = vsel %vm872_vm0, %v1985_v12, %v869_v14  ;;  %v996_v55 = vsub.f32 1.0, %v995_v7  ;;  %1992 = vrcp.f32 %v3425_v21 }
 0x148   : > { %v878_v11 = vsel %vm3421_vm15, %v877_v60, %v873_v28  ;;  %v1009_v23 = vmul.f32 %v3435_v6, %v3385_v49  ;;  %v1017_v15 = vand.u32 2147483647, %v3385_v49  ;;  %v1019_v9 = vand.u32 2147483648, %v3385_v49  ;;  %v726_v60 = vld [vmem:[#allocation2] sm:$0x1] }
 0x149   : > { %v886_v47 = vmul.f32 %v878_v11, %v750_v32  ;;  %v997_v48 = vmul.f32 %v3418_v45, %v996_v55  ;;  %v1006_v38 = vor.u32 1.1754944e-38, %v1005_v57  ;;  %vm1013_vm2 = vweird.f32 %v3385_v49 }
 0x14a   : > { %vm3446_vm3 = vcmp.eq.f32.partialorder %v1003_v17, 8.507059e+37  ;;  %v1010_v24 = vsub.f32 1.0, %v1009_v23  ;;  %v989_v1 = vand.u32 2147483647, %v3416_v50  ;;  %1994 = vrcp.f32 %v3433_v3 }
 0x14b   : > { %v941_v10 = vmul.f32 %v3111_v59, %v2699_v18  ;;  %v3454_v40 = vadd.f32 %v1073_v19, %v1072_v51  ;;  %v894_v26 = vsub.f32 1.0, %v886_v47  ;;  %vm1000_vm4 = vweird.f32 %v3418_v45  ;;  %v927_v51 = vpop.xlane.xlu1 %926 }
 0x14c   : > { %v991_v37 = vand.u32 2147483648, %v3416_v50  ;;  %v1991_v2 = vpop.eup %1990  ;;  %v998_v0 = vadd.f32 %v3418_v45, %v997_v48  ;;  %v1011_v16 = vmul.f32 %v3435_v6, %v1010_v24  ;;  %vm3460_vm5 = vcmp.eq.f32.partialorder %v1017_v15, 8.507059e+37  ;;  %vm3482_vm9 = vmor %vm999_vm1, %vm1000_vm4 }
 0x14d   : > { %v1020_v39 = vor.u32 1.1754944e-38, %v1019_v9  ;;  %vm985_vm6 = vweird.f32 %v3416_v50  ;;  %v3465_v18 = vpop.eup %1992  ;;  %v901_v42 = vadd.f32 %v900_v63, %v894_v26  ;;  %vm1014_vm7 = vweird.f32 %v3435_v6  ;;  %v929_v9 = vpop.xlane.xlu2 %928 }
 0x14e   : > { %v981_v33 = vmul.f32 %v1991_v2, %v3416_v50  ;;  %v1047_v43 = vand.u32 2147483648, %v3425_v21  ;;  %v1012_v61 = vadd.f32 %v3435_v6, %v1011_v16  ;;  %vm3471_vm8 = vcmp.eq.f32.partialorder %v989_v1, 8.507059e+37  ;;  %vm3500_vm12 = vmor %vm1013_vm2, %vm1014_vm7 }
 0x14f   : > { %v1037_v14 = vmul.f32 %v3465_v18, %v3425_v21  ;;  %v1045_v7 = vand.u32 2147483647, %v3425_v21  ;;  %v902_v57 = vrot.slane %v901_v42, 4  ;;  %v992_v17 = vor.u32 1.1754944e-38, %v991_v37 }
 0x150   : > { %v982_v32 = vsub.f32 1.0, %v981_v33  ;;  %vm1041_vm10 = vweird.f32 %v3425_v21  ;;  %v3487_v19 = vpop.eup %1994  ;;  %v1002_v28 = vsel %vm3482_vm9, %v3418_v45, %v998_v0  ;;  %vm1055_vm11 = vweird.f32 %v3433_v3 }
 0x151   : > { %v1038_v55 = vsub.f32 1.0, %v1037_v14  ;;  %v1059_v56 = vand.u32 2147483647, %v3433_v3  ;;  %v3494_v11 = vadd.f32 1e-08, %v941_v10  ;;  %v903_v23 = vadd.f32 %v902_v57, %v901_v42 }
 0x152   : > { %v983_v47 = vmul.f32 %v1991_v2, %v982_v32  ;;  %vm986_vm13 = vweird.f32 %v1991_v2  ;;  %v1048_v45 = vor.u32 1.1754944e-38, %v1047_v43  ;;  %vm909_vm14 = vcmask 0  }
 0x153   : > { %v1016_v48 = vsel %vm3500_vm12, %v3435_v6, %v1012_v61  ;;  %v1039_v24 = vmul.f32 %v3465_v18, %v1038_v55  ;;  %vm3508_vm15 = vcmp.eq.f32.partialorder %v1045_v7, 8.507059e+37  ;;  %v1051_v49 = vmul.f32 %v3487_v19, %v3433_v3  ;;  %vm987_vm0 = vmor %vm985_vm6, %vm986_vm13  ;;  %v925_v6 = vpop.xlane.xlu0 %924  ;;  %v933_v15 = vpop.xlane.xlu1 %932 }
 0x154   : > { %v1061_v10 = vand.u32 2147483648, %v3433_v3  ;;  %v904_v26 = vrot.slane %v903_v23, 2  ;;  %v1007_v37 = vsel %vm3446_vm3, %v1006_v38, %v1002_v28  ;;  %v984_v0 = vadd.f32 %v1991_v2, %v983_v47 }
 0x155   : > { %1996 = vrcp.f32 %v3494_v11  ;;  %v1067_v16 = vmul.f32 %v1007_v37, %v927_v51  ;;  %v1040_v42 = vadd.f32 %v3465_v18, %v1039_v24  ;;  %vm1042_vm1 = vweird.f32 %v3465_v18  ;;  %v935_v37 = vpop.xlane.xlu2 %934 }
 0x156   : > { %v1052_v33 = vsub.f32 1.0, %v1051_v49  ;;  %v905_v43 = vadd.f32 %v904_v26, %v903_v23  ;;  %v1021_v61 = vsel %vm3460_vm5, %v1020_v39, %v1016_v48  ;;  %v988_v14 = vsel %vm987_vm0, %v1991_v2, %v984_v0  ;;  %vm3533_vm4 = vmor %vm1041_vm10, %vm1042_vm1 }
 0x157   : > { %v1121_v38 = vmul.f32 %v2971_v30, %v2871_v20  ;;  %v1068_v12 = vmul.f32 %v1021_v61, %v929_v9  ;;  %v993_v7 = vsel %vm3471_vm8, %v992_v17, %v988_v14  ;;  %vm1056_vm2 = vweird.f32 %v3487_v19 }
 0x158   : > { %v1053_v50 = vmul.f32 %v3487_v19, %v1052_v33  ;;  %vm675_vm3 = vcmp.eq.f32.partialorder %v2943_v31, 0.0  ;;  %v906_v57 = vrot.slane %v905_v43, 1  ;;  %v1066_v63 = vmul.f32 %v993_v7, %v925_v6  ;;  %vm3551_vm6 = vmor %vm1055_vm11, %vm1056_vm2 }
 0x159   : > { %vm3537_vm5 = vcmp.eq.f32.partialorder %v1059_v56, 8.507059e+37  ;;  %v1062_v39 = vor.u32 1.1754944e-38, %v1061_v10  ;;  %v1075_v51 = vsub.f32 1.0, %v1067_v16  ;;  %v1044_v32 = vsel %vm3533_vm4, %v3465_v18, %v1040_v42 }
 0x15a   : > { %v1054_v17 = vadd.f32 %v3487_v19, %v1053_v50  ;;  %v3545_v28 = vadd.f32 1e-08, %v1121_v38  ;;  %v907_v55 = vadd.f32 %v906_v57, %v905_v43  ;;  %v1074_v23 = vsub.f32 1.0, %v1066_v63 }
 0x15b   : > { %v1997_v21 = vpop.eup %1996  ;;  %v1304_v9 = vmul.f32 %v3160_v41, %v2751_v22  ;;  %v1488_v18 = vmul.f32 %v3160_v41, %v2980_v27  ;;  %v1076_v47 = vsub.f32 1.0, %v1068_v12  ;;  %v1120_v3 = vmul.f32 %v2980_v27, %v2751_v22  ;;  %v931_v57 = vpop.xlane.xlu0 %930 }
 0x15c   : > { %v1058_v48 = vsel %vm3551_vm6, %v3487_v19, %v1054_v17  ;;  %v1023_v24 = vmul.f32 %v1997_v21, %v3494_v11  ;;  %v908_v49 = vadd.f32 %v907_v55, %v726_v60  ;;  %v1081_v10 = vadd.f32 %v3454_v40, %v1074_v23 }
 0x15d   : > { %v1049_v26 = vsel %vm3508_vm15, %v1048_v45, %v1044_v32  ;;  %1998 = vrcp.f32 %v3545_v28  ;;  %v1031_v16 = vand.u32 2147483647, %v3494_v11  ;;  %v1033_v19 = vand.u32 2147483648, %v3494_v11 }
 0x15e   : > { %v3569_v41 = vmul.f32 %v1049_v26, %v933_v15  ;;  %v1024_v0 = vsub.f32 1.0, %v1023_v24  ;;  %910 = vst.msk [vmem:[#allocation2] sm:$0x1] %vm909_vm14, %v908_v49  ;;  %v1082_v6 = vadd.f32 %v1081_v10, %v1075_v51  ;;  %v1063_v22 = vsel %vm3537_vm5, %v1062_v39, %v1058_v48 }
 0x15f   : > { %v3576_v27 = vadd.f32 1e-08, %v1304_v9  ;;  %v1489_v40 = vmul.f32 %v3147_v5, %v2971_v30  ;;  %v3580_v45 = vmul.f32 %v1063_v22, %v935_v37  ;;  %vm1028_vm7 = vweird.f32 %v1997_v21  ;;  %v1107_v37 = vpop.xlane.xlu1 %1106 }
 0x160   : > { %v1025_v1 = vmul.f32 %v1997_v21, %v1024_v0  ;;  %v3582_v42 = vadd.f32 1e-08, %v1120_v3  ;;  %v1083_v33 = vadd.f32 %v1082_v6, %v1076_v47  ;;  %v1159_v43 = vand.u32 2147483647, %v3545_v28 }
 0x161   : > { %v1161_v61 = vand.u32 2147483648, %v3545_v28  ;;  %2000 = vrcp.f32 %v3576_v27  ;;  %v4179_v14 = vand.u32 2147483648, %v2943_v31  ;;  %vm1027_vm8 = vweird.f32 %v3494_v11 }
 0x162   : > { %v1026_v30 = vadd.f32 %v1997_v21, %v1025_v1  ;;  %2002 = vrcp.f32 %v3582_v42  ;;  %v1078_v7 = vsub.f32 1.0, %v3569_v41  ;;  %vm1029_vm9 = vmor %vm1027_vm8, %vm1028_vm7  ;;  %vm1032_vm10 = vcmp.eq.f32.partialorder %v1031_v16, 8.507059e+37 }
 0x163   : > { %v3592_v38 = vsel %vm675_vm3, %v4179_v14, %v3214_v58  ;;  %v1999_v12 = vpop.eup %1998  ;;  %v1034_v50 = vor.u32 1.1754944e-38, %v1033_v19  ;;  %v3597_v63 = vadd.f32 1e-08, %v1488_v18  ;;  %v1079_v25 = vsub.f32 1.0, %v3580_v45  ;;  %v3648_v14 = vpop.xlane.xlu2 %1288 }
 0x164   : > { %v1030_v2 = vsel %vm1029_vm9, %v1997_v21, %v1026_v30  ;;  %v1151_v31 = vmul.f32 %v1999_v12, %v3545_v28  ;;  %vm1155_vm11 = vweird.f32 %v3545_v28  ;;  %vm3602_vm12 = vcmp.eq.f32.partialorder %v1159_v43, 8.507059e+37  ;;  %v911_v30 = vld [vmem:[#allocation3] sm:$0x1] }
 0x165   : > { %v1035_v58 = vsel %vm1032_vm10, %v1034_v50, %v1030_v2  ;;  %v1162_v39 = vor.u32 1.1754944e-38, %v1161_v61  ;;  %v1331_v60 = vand.u32 2147483648, %v3576_v27  ;;  %v1145_v51 = vand.u32 2147483647, %v3582_v42 }
 0x166   : > { %v1069_v32 = vmul.f32 %v1035_v58, %v931_v57  ;;  %v1152_v17 = vsub.f32 1.0, %v1151_v31  ;;  %v1329_v55 = vand.u32 2147483647, %v3576_v27  ;;  %2004 = vrcp.f32 %v3597_v63  ;;  %v1105_v58 = vpop.xlane.xlu0 %1104 }
 0x167   : > { %v3610_v21 = vpop.eup %2000  ;;  %vm1156_vm13 = vweird.f32 %v1999_v12  ;;  %vm1141_vm15 = vweird.f32 %v3582_v42  ;;  %v1147_v23 = vand.u32 2147483648, %v3582_v42  ;;  %v3614_v15 = vadd.f32 1e-08, %v1489_v40 }
 0x168   : > { %v2003_v56 = vpop.eup %2002  ;;  %v1077_v9 = vsub.f32 1.0, %v1069_v32  ;;  %v1153_v18 = vmul.f32 %v1999_v12, %v1152_v17  ;;  %v1321_v47 = vmul.f32 %v3610_v21, %v3576_v27  ;;  %v1305_v48 = vmul.f32 %v3147_v5, %v2871_v20  ;;  %vm3633_vm2 = vmor %vm1155_vm11, %vm1156_vm13 }
 0x169   : > { %v3620_v24 = vor.u32 1.1754944e-38, %v1331_v60  ;;  %v1137_v3 = vmul.f32 %v2003_v56, %v3582_v42  ;;  %vm3623_vm0 = vcmp.eq.f32.partialorder %v1145_v51, 8.507059e+37  ;;  %v1513_v10 = vand.u32 2147483647, %v3597_v63 }
 0x16a   : > { %v1084_v26 = vadd.f32 %v1083_v33, %v1077_v9  ;;  %v1154_v41 = vadd.f32 %v1999_v12, %v1153_v18  ;;  %v1322_v0 = vsub.f32 1.0, %v1321_v47  ;;  %vm1325_vm1 = vweird.f32 %v3576_v27 }
 0x16b   : > { %2006 = vrcp.f32 %v3614_v15  ;;  %v1138_v5 = vsub.f32 1.0, %v1137_v3  ;;  %v1148_v16 = vor.u32 1.1754944e-38, %v1147_v23  ;;  %vm1509_vm3 = vweird.f32 %v3597_v63 }
 0x16c   : > { %v1515_v19 = vand.u32 2147483648, %v3597_v63  ;;  %v2005_v6 = vpop.eup %2004  ;;  %v1085_v22 = vadd.f32 %v1084_v26, %v1078_v7  ;;  %v1158_v40 = vsel %vm3633_vm2, %v1999_v12, %v1154_v41  ;;  %v1323_v45 = vmul.f32 %v3610_v21, %v1322_v0 }
 0x16d   : > { %v3642_v1 = vadd.f32 1e-08, %v1305_v48  ;;  %vm1326_vm4 = vweird.f32 %v3610_v21  ;;  %v1139_v28 = vmul.f32 %v2003_v56, %v1138_v5  ;;  %vm1142_vm5 = vweird.f32 %v2003_v56 }
 0x16e   : > { %v1505_v33 = vmul.f32 %v2005_v6, %v3597_v63  ;;  %v1086_v43 = vadd.f32 %v1085_v22, %v1079_v25  ;;  %v1163_v61 = vsel %vm3602_vm12, %v1162_v39, %v1158_v40  ;;  %vm3650_vm6 = vcmp.eq.f32.partialorder %v1513_v10, 8.507059e+37  ;;  %vm1143_vm7 = vmor %vm1141_vm15, %vm1142_vm5  ;;  %v1473_v10 = vpop.xlane.xlu1 %1472 }
 0x16f   : > { %v1527_v12 = vand.u32 2147483647, %v3614_v15  ;;  %v1249_v7 = vmul.f32 %v1163_v61, %v1107_v37  ;;  %v1140_v50 = vadd.f32 %v2003_v56, %v1139_v28  ;;  %2008 = vrcp.f32 %v3642_v1  ;;  %vm3676_vm12 = vmor %vm1325_vm1, %vm1326_vm4  ;;  %v1475_v28 = vpop.xlane.xlu2 %1474 }
 0x170   : > { %v1506_v57 = vsub.f32 1.0, %v1505_v33  ;;  %v1087_v31 = vrot.slane %v1086_v43, 4  ;;  %v1324_v25 = vadd.f32 %v3610_v21, %v1323_v45  ;;  %v1516_v11 = vor.u32 1.1754944e-38, %v1515_v19 }
 0x171   : > { %v2007_v2 = vpop.eup %2006  ;;  %v1529_v39 = vand.u32 2147483648, %v3614_v15  ;;  %v1144_v60 = vsel %vm1143_vm7, %v2003_v56, %v1140_v50  ;;  %vm1510_vm8 = vweird.f32 %v2005_v6  ;;  %vm3661_vm9 = vcmp.eq.f32.partialorder %v1329_v55, 8.507059e+37 }
 0x172   : > { %v1507_v51 = vmul.f32 %v2005_v6, %v1506_v57  ;;  %v1519_v32 = vmul.f32 %v2007_v2, %v3614_v15  ;;  %v1088_v17 = vadd.f32 %v1087_v31, %v1086_v43  ;;  %v1149_v9 = vsel %vm3623_vm0, %v1148_v16, %v1144_v60  ;;  %vm1511_vm13 = vmor %vm1509_vm3, %vm1510_vm8 }
 0x173   : > { %vm1523_vm10 = vweird.f32 %v3614_v15  ;;  %vm3668_vm11 = vcmp.eq.f32.partialorder %v1527_v12, 8.507059e+37  ;;  %v1257_v18 = vsub.f32 1.0, %v1249_v7  ;;  %v1248_v55 = vmul.f32 %v1149_v9, %v1105_v58 }
 0x174   : > { %v1508_v47 = vadd.f32 %v2005_v6, %v1507_v51  ;;  %v1520_v48 = vsub.f32 1.0, %v1519_v32  ;;  %v1089_v3 = vrot.slane %v1088_v17, 2  ;;  %v1328_v49 = vsel %vm3676_vm12, %v3610_v21, %v1324_v25  ;;  %v1291_v32 = vpop.xlane.xlu0 %1290 }
 0x175   : > { %v1530_v26 = vor.u32 1.1754944e-38, %v1529_v39  ;;  %v1306_v27 = vmul.f32 %v3135_v46, %v2865_v54  ;;  %v2009_v37 = vpop.eup %2008  ;;  %v1256_v41 = vsub.f32 1.0, %v1248_v55  ;;  %vm1524_vm15 = vweird.f32 %v2007_v2 }
 0x176   : > { %v1512_v0 = vsel %vm1511_vm13, %v2005_v6, %v1508_v47  ;;  %v1521_v20 = vmul.f32 %v2007_v2, %v1520_v48  ;;  %v1090_v5 = vadd.f32 %v1089_v3, %v1088_v17  ;;  %v1335_v21 = vmul.f32 %v2009_v37, %v3642_v1  ;;  %vm1525_vm2 = vmor %vm1523_vm10, %vm1524_vm15  ;;  %v4195_v3 = vld [vmem:[#allocation28_spill] sm:$0xff] }
 0x177   : > { %v1517_v16 = vsel %vm3650_vm6, %v1516_v11, %v1512_v0  ;;  %v1343_v19 = vand.u32 2147483647, %v3642_v1  ;;  %vm697_vm0 = vcmp.eq.f32.partialorder %v2934_v8, inf  ;;  %vm687_vm1 = vcmp.eq.f32.partialorder %v2925_v52, 0.0 }
 0x178   : > { %v3694_v63 = vadd.f32 %v1257_v18, %v1256_v41  ;;  %v1616_v22 = vmul.f32 %v1517_v16, %v1473_v10  ;;  %v1522_v40 = vadd.f32 %v2007_v2, %v1521_v20  ;;  %v1345_v6 = vand.u32 2147483648, %v3642_v1 }
 0x179   : > { %v1091_v45 = vrot.slane %v1090_v5, 1  ;;  %v1336_v33 = vsub.f32 1.0, %v1335_v21  ;;  %v3699_v43 = vadd.f32 1e-08, %v1306_v27  ;;  %v1490_v61 = vmul.f32 %v3135_v46, %v3062_v34 }
 0x17a   : > { %v1526_v12 = vsel %vm1525_vm2, %v2007_v2, %v1522_v40  ;;  %vm1340_vm3 = vweird.f32 %v2009_v37  ;;  %v1122_v7 = vmul.f32 %v3062_v34, %v2865_v54  ;;  %v1307_v50 = vmul.f32 %v3592_v38, %v2833_v36 }
 0x17b   : > { %v1092_v57 = vadd.f32 %v1091_v45, %v1090_v5  ;;  %v1531_v15 = vsel %vm3668_vm11, %v1530_v26, %v1526_v12  ;;  %v1337_v31 = vmul.f32 %v2009_v37, %v1336_v33  ;;  %2010 = vrcp.f32 %v3699_v43 }
 0x17c   : > { %v1333_v46 = vsel %vm3661_vm9, %v3620_v24, %v1328_v49  ;;  %v1624_v25 = vsub.f32 1.0, %v1616_v22  ;;  %v1617_v2 = vmul.f32 %v1531_v15, %v1475_v28  ;;  %vm1339_vm4 = vweird.f32 %v3642_v1 }
 0x17d   : > { %v1093_v58 = vadd.f32 %v1092_v57, %v911_v30  ;;  %v1338_v54 = vadd.f32 %v2009_v37, %v1337_v31  ;;  %v3714_v34 = vadd.f32 1e-08, %v1490_v61  ;;  %v3716_v11 = vadd.f32 1e-08, %v1122_v7  ;;  %vm1341_vm5 = vmor %vm1339_vm4, %vm1340_vm3 }
 0x17e   : > { %v1432_v39 = vmul.f32 %v1333_v46, %v3648_v14  ;;  %v1625_v60 = vsub.f32 1.0, %v1617_v2  ;;  %vm1344_vm6 = vcmp.eq.f32.partialorder %v1343_v19, 8.507059e+37  ;;  %v1346_v51 = vor.u32 1.1754944e-38, %v1345_v6  ;;  %v1293_v6 = vpop.xlane.xlu1 %1292 }
 0x17f   : > { %1094 = vst.msk [vmem:[#allocation3] sm:$0x1] %vm909_vm14, %v1093_v58  ;;  %v1342_v24 = vsel %vm1341_vm5, %v2009_v37, %v1338_v54  ;;  %v1357_v17 = vand.u32 2147483647, %v3699_v43  ;;  %2012 = vrcp.f32 %v3714_v34  ;;  %v3723_v1 = vadd.f32 1e-08, %v1307_v50 }
 0x180   : > { %v3725_v23 = vadd.f32 %v1625_v60, %v1624_v25  ;;  %v1347_v9 = vsel %vm1344_vm6, %v1346_v51, %v1342_v24  ;;  %v1359_v14 = vand.u32 2147483648, %v3699_v43  ;;  %2014 = vrcp.f32 %v3716_v11  ;;  %v1477_v60 = vpop.xlane.xlu2 %1476 }
 0x181   : > { %v2011_v42 = vpop.eup %2010  ;;  %v3733_v18 = vsel %vm697_vm0, %v2934_v8, %v3181_v13  ;;  %v4194_v56 = vand.u32 2147483648, %v2925_v52  ;;  %v3743_v47 = vmul.f32 0.5, %v3164_v44  ;;  %v1433_v48 = vmul.f32 %v1347_v9, %v1291_v32 }
 0x182   : > { %v706_v49 = vsub.f32 1.5, %v4195_v3  ;;  %v1440_v10 = vsub.f32 1.0, %v1432_v39  ;;  %v1349_v26 = vmul.f32 %v2011_v42, %v3699_v43  ;;  %v1541_v27 = vand.u32 2147483647, %v3714_v34 }
 0x183   : > { %v3740_v55 = vsel %vm687_vm1, %v4194_v56, %v3190_v35  ;;  %v1441_v13 = vsub.f32 1.0, %v1433_v48  ;;  %vm1353_vm7 = vweird.f32 %v3699_v43  ;;  %vm3749_vm8 = vcmp.eq.f32.partialorder %v1357_v17, 8.507059e+37 }
 0x184   : > { %2016 = vrcp.f32 %v3723_v1  ;;  %v1350_v52 = vsub.f32 1.0, %v1349_v26  ;;  %v1360_v44 = vor.u32 1.1754944e-38, %v1359_v14  ;;  %vm1537_vm9 = vweird.f32 %v3714_v34 }
 0x185   : > { %v1543_v35 = vand.u32 2147483648, %v3714_v34  ;;  %v2013_v41 = vpop.eup %2012  ;;  %v1448_v0 = vadd.f32 %v1441_v13, %v1440_v10  ;;  %v1173_v20 = vand.u32 2147483647, %v3716_v11  ;;  %v1491_v5 = vmul.f32 %v3592_v38, %v3056_v4  ;;  %v4200_v38 = vld [vmem:[#allocation22_spill] sm:$0xff] }
 0x186   : > { %v1123_v16 = vmul.f32 %v3056_v4, %v2833_v36  ;;  %v2015_v21 = vpop.eup %2014  ;;  %v1351_v19 = vmul.f32 %v2011_v42, %v1350_v52  ;;  %vm1354_vm10 = vweird.f32 %v2011_v42  ;;  %v1533_v22 = vmul.f32 %v2013_v41, %v3714_v34 }
 0x187   : > { %vm3762_vm11 = vcmp.eq.f32.partialorder %v1541_v27, 8.507059e+37  ;;  %v1165_v45 = vmul.f32 %v2015_v21, %v3716_v11  ;;  %vm1169_vm12 = vweird.f32 %v3716_v11  ;;  %v3768_v28 = vadd.f32 1e-08, %v1491_v5  ;;  %vm1355_vm13 = vmor %vm1353_vm7, %vm1354_vm10 }
 0x188   : > { %v1308_v33 = vmul.f32 %v3740_v55, %v4200_v38  ;;  %v1352_v36 = vadd.f32 %v2011_v42, %v1351_v19  ;;  %v1534_v4 = vsub.f32 1.0, %v1533_v22  ;;  %v1544_v61 = vor.u32 1.1754944e-38, %v1543_v35 }
 0x189   : > { %v3772_v30 = vadd.f32 1e-08, %v1123_v16  ;;  %v1166_v7 = vsub.f32 1.0, %v1165_v45  ;;  %vm3776_vm15 = vcmp.eq.f32.partialorder %v1173_v20, 8.507059e+37  ;;  %v1175_v57 = vand.u32 2147483648, %v3716_v11 }
 0x18a   : > { %v2017_v12 = vpop.eup %2016  ;;  %2018 = vrcp.f32 %v3768_v28  ;;  %v1356_v15 = vsel %vm1355_vm13, %v2011_v42, %v1352_v36  ;;  %v1535_v31 = vmul.f32 %v2013_v41, %v1534_v4  ;;  %vm1538_vm0 = vweird.f32 %v2013_v41  ;;  %v1109_v42 = vpop.xlane.xlu0 %1108 }
 0x18b   : > { %v1363_v46 = vmul.f32 %v2017_v12, %v3723_v1  ;;  %vm699_vm1 = vcmp.eq.f32.partialorder %v2934_v8, 0.0  ;;  %v1361_v43 = vsel %vm3749_vm8, %v1360_v44, %v1356_v15  ;;  %v1167_v25 = vmul.f32 %v2015_v21, %v1166_v7  ;;  %vm1539_vm3 = vmor %vm1537_vm9, %vm1538_vm0  ;;  %v1295_v44 = vpop.xlane.xlu1 %1294 }
 0x18c   : > { %vm1170_vm2 = vweird.f32 %v2015_v21  ;;  %v3786_v2 = vadd.f32 1e-08, %v1308_v33  ;;  %v1434_v58 = vmul.f32 %v1361_v43, %v1293_v6  ;;  %v1536_v54 = vadd.f32 %v2013_v41, %v1535_v31  ;;  %v4204_v6 = vld [vmem:[#allocation27_spill] sm:$0xff] }
 0x18d   : > { %v1364_v39 = vsub.f32 1.0, %v1363_v46  ;;  %2020 = vrcp.f32 %v3772_v30  ;;  %v1168_v51 = vadd.f32 %v2015_v21, %v1167_v25  ;;  %v1176_v32 = vor.u32 1.1754944e-38, %v1175_v57  ;;  %vm1171_vm4 = vmor %vm1169_vm12, %vm1170_vm2  ;;  %v1479_v57 = vpop.xlane.xlu2 %1478 }
 0x18e   : > { %v1371_v24 = vand.u32 2147483647, %v3723_v1  ;;  %v1373_v17 = vand.u32 2147483648, %v3723_v1  ;;  %v1442_v9 = vsub.f32 1.0, %v1434_v58  ;;  %v1540_v14 = vsel %vm1539_vm3, %v2013_v41, %v1536_v54  ;;  %v4205_v54 = vld [vmem:[#allocation21_spill] sm:$0xff] }
 0x18f   : > { %v1365_v56 = vmul.f32 %v2017_v12, %v1364_v39  ;;  %vm1368_vm5 = vweird.f32 %v2017_v12  ;;  %v1545_v10 = vsel %vm3762_vm11, %v1544_v61, %v1540_v14  ;;  %v1172_v34 = vsel %vm1171_vm4, %v2015_v21, %v1168_v51 }
 0x190   : > { %v2019_v48 = vpop.eup %2018  ;;  %vm1367_vm6 = vweird.f32 %v3723_v1  ;;  %2022 = vrcp.f32 %v3786_v2  ;;  %v1449_v26 = vadd.f32 %v1448_v0, %v1442_v9  ;;  %v1618_v27 = vmul.f32 %v1545_v10, %v1477_v60 }
 0x191   : > { %v1177_v13 = vsel %vm3776_vm15, %v1176_v32, %v1172_v34  ;;  %v1366_v37 = vadd.f32 %v2017_v12, %v1365_v56  ;;  %v718_v11 = vsub.f32 1.5, %v3743_v47  ;;  %vm1369_vm7 = vmor %vm1367_vm6, %vm1368_vm5  ;;  %v1374_v35 = vor.u32 1.1754944e-38, %v1373_v17  ;;  %v4207_v32 = vld [vmem:[#allocation26_spill] sm:$0xff]  ;;  %v4208_v17 = vld [vmem:[#allocation25_spill] sm:$0xff] }
 0x192   : > { %v1250_v52 = vmul.f32 %v1177_v13, %v1109_v42  ;;  %v1547_v41 = vmul.f32 %v2019_v48, %v3768_v28  ;;  %v1626_v5 = vsub.f32 1.0, %v1618_v27  ;;  %vm1372_vm8 = vcmp.eq.f32.partialorder %v1371_v24, 8.507059e+37 }
 0x193   : > { %v3803_v20 = vpop.eup %2020  ;;  %v1370_v1 = vsel %vm1369_vm7, %v2017_v12, %v1366_v37  ;;  %v1555_v0 = vand.u32 2147483647, %v3768_v28  ;;  %v1557_v22 = vand.u32 2147483648, %v3768_v28  ;;  %v4203_v47 = vand.u32 2147483648, %v2934_v8  ;;  %v1297_v56 = vpop.xlane.xlu1 %1296 }
 0x194   : > { %v1258_v16 = vsub.f32 1.0, %v1250_v52  ;;  %v1375_v21 = vsel %vm1372_vm8, %v1374_v35, %v1370_v1  ;;  %v1548_v19 = vsub.f32 1.0, %v1547_v41  ;;  %v707_v45 = vmul.f32 %v4204_v6, %v706_v49 }
 0x195   : > { %v701_v40 = vsel %vm699_vm1, %v4203_v47, %v3733_v18  ;;  %v1633_v33 = vadd.f32 %v3725_v23, %v1626_v5  ;;  %v1435_v36 = vmul.f32 %v1375_v21, %v1295_v44  ;;  %vm1552_vm9 = vweird.f32 %v2019_v48 }
 0x196   : > { %v2023_v4 = vpop.eup %2022  ;;  %v3817_v61 = vadd.f32 %v3694_v63, %v1258_v16  ;;  %v1549_v12 = vmul.f32 %v2019_v48, %v1548_v19  ;;  %v1179_v7 = vmul.f32 %v3803_v20, %v3772_v30  ;;  %vm1551_vm10 = vweird.f32 %v3768_v28 }
 0x197   : > { %v1443_v50 = vsub.f32 1.0, %v1435_v36  ;;  %v1377_v8 = vmul.f32 %v2023_v4, %v3786_v2  ;;  %v1492_v18 = vmul.f32 %v3740_v55, %v3025_v53  ;;  %vm1556_vm11 = vcmp.eq.f32.partialorder %v1555_v0, 8.507059e+37  ;;  %vm1553_vm12 = vmor %vm1551_vm10, %vm1552_vm9 }
 0x198   : > { %v1550_v3 = vadd.f32 %v2019_v48, %v1549_v12  ;;  %v1558_v23 = vor.u32 1.1754944e-38, %v1557_v22  ;;  %v1124_v63 = vmul.f32 %v3025_v53, %v4200_v38  ;;  %v1385_v31 = vand.u32 2147483647, %v3786_v2  ;;  %v4206_v53 = vld [vmem:[#allocation24_spill] sm:$0xff] }
 0x199   : > { %v1450_v49 = vadd.f32 %v1449_v26, %v1443_v50  ;;  %v1378_v15 = vsub.f32 1.0, %v1377_v8  ;;  %v3828_v46 = vadd.f32 1e-08, %v1492_v18  ;;  %v1180_v43 = vsub.f32 1.0, %v1179_v7  ;;  %v1481_v18 = vpop.xlane.xlu2 %1480 }
 0x19a   : > { %v1554_v28 = vsel %vm1553_vm12, %v2019_v48, %v1550_v3  ;;  %vm1382_vm13 = vweird.f32 %v2023_v4  ;;  %v1387_v25 = vand.u32 2147483648, %v3786_v2  ;;  %v1309_v39 = vmul.f32 %v701_v40, %v4205_v54  ;;  %v4213_v3 = vld [vmem:[#allocation20_spill] sm:$0xff] }
 0x19b   : > { %v1559_v55 = vsel %vm1556_vm11, %v1558_v23, %v1554_v28  ;;  %v1379_v58 = vmul.f32 %v2023_v4, %v1378_v15  ;;  %2024 = vrcp.f32 %v3828_v46  ;;  %vm721_vm15 = vcmp.eq.f32.partialorder %v4206_v53, inf }
 0x19c   : > { %v1619_v38 = vmul.f32 %v1559_v55, %v1479_v57  ;;  %v3834_v60 = vadd.f32 1e-08, %v1124_v63  ;;  %v1493_v51 = vmul.f32 %v701_v40, %v3111_v59  ;;  %v719_v24 = vmul.f32 %v4207_v32, %v718_v11  ;;  %v1111_v55 = vpop.xlane.xlu0 %1110 }
 0x19d   : > { %v708_v9 = vmul.f32 %v707_v45, %v4208_v17  ;;  %v1380_v14 = vadd.f32 %v2023_v4, %v1379_v58  ;;  %vm1381_vm0 = vweird.f32 %v3786_v2  ;;  %vm709_vm1 = vcmp.eq.f32.partialorder %v4208_v17, inf }
 0x19e   : > { %vm711_vm2 = vcmp.eq.f32.partialorder %v4208_v17, 0.0  ;;  %v1627_v42 = vsub.f32 1.0, %v1619_v38  ;;  %vm1383_vm3 = vmor %vm1381_vm0, %vm1382_vm13  ;;  %v1388_v48 = vor.u32 1.1754944e-38, %v1387_v25  ;;  %v1181_v10 = vmul.f32 %v3803_v20, %v1180_v43 }
 0x19f   : > { %v1384_v34 = vsel %vm1383_vm3, %v2023_v4, %v1380_v14  ;;  %vm1386_vm4 = vcmp.eq.f32.partialorder %v1385_v31, 8.507059e+37  ;;  %v3844_v26 = vadd.f32 1e-08, %v1309_v39  ;;  %2026 = vrcp.f32 %v3834_v60 }
 0x1a0   : > { %v3846_v27 = vadd.f32 %v1633_v33, %v1627_v42  ;;  %v1389_v13 = vsel %vm1386_vm4, %v1388_v48, %v1384_v34  ;;  %v3849_v2 = vadd.f32 1e-08, %v1493_v51  ;;  %v720_v11 = vmul.f32 %v719_v24, %v4206_v53 }
 0x1a1   : > { %v2025_v37 = vpop.eup %2024  ;;  %v710_v52 = vsel %vm709_vm1, %v4208_v17, %v708_v9  ;;  %v1436_v44 = vmul.f32 %v1389_v13, %v1297_v56  ;;  %2028 = vrcp.f32 %v3844_v26  ;;  %v712_v35 = vand.u32 2147483648, %v4208_v17  ;;  %v1299_v13 = vpop.xlane.xlu1 %1298 }
 0x1a2   : > { %v1187_v41 = vand.u32 2147483647, %v3772_v30  ;;  %v1189_v5 = vand.u32 2147483648, %v3772_v30  ;;  %v1561_v1 = vmul.f32 %v2025_v37, %v3828_v46  ;;  %v1182_v0 = vadd.f32 %v3803_v20, %v1181_v10 }
 0x1a3   : > { %vm1184_vm5 = vweird.f32 %v3803_v20  ;;  %v1444_v16 = vsub.f32 1.0, %v1436_v44  ;;  %2030 = vrcp.f32 %v3849_v2  ;;  %v713_v21 = vsel %vm711_vm2, %v712_v35, %v710_v52  ;;  %v1483_v35 = vpop.xlane.xlu2 %1482 }
 0x1a4   : > { %v1562_v19 = vsub.f32 1.0, %v1561_v1  ;;  %v1569_v22 = vand.u32 2147483647, %v3828_v46  ;;  %v1571_v47 = vand.u32 2147483648, %v3828_v46  ;;  %v722_v40 = vsel %vm721_vm15, %v4206_v53, %v720_v11  ;;  %v1113_v4 = vpop.xlane.xlu0 %1112 }
 0x1a5   : > { %v724_v6 = vand.u32 2147483648, %v4206_v53  ;;  %vm1183_vm6 = vweird.f32 %v3772_v30  ;;  %v3872_v45 = vadd.f32 %v1450_v49, %v1444_v16  ;;  %v3874_v33 = vpop.eup %2026  ;;  %vm723_vm7 = vcmp.eq.f32.partialorder %v4206_v53, 0.0 }
 0x1a6   : > { %vm3877_vm8 = vmor %vm1183_vm6, %vm1184_vm5  ;;  %vm3881_vm9 = vcmp.eq.f32.partialorder %v1187_v41, 8.507059e+37  ;;  %v1563_v12 = vmul.f32 %v2025_v37, %v1562_v19  ;;  %vm1566_vm10 = vweird.f32 %v2025_v37  ;;  %v1125_v7 = vmul.f32 %v3111_v59, %v4205_v54 }
 0x1a7   : > { %v2029_v30 = vpop.eup %2028  ;;  %v1186_v50 = vsel %vm3877_vm8, %v3803_v20, %v1182_v0  ;;  %v1190_v8 = vor.u32 1.1754944e-38, %v1189_v5  ;;  %vm1565_vm11 = vweird.f32 %v3828_v46  ;;  %v1310_v23 = vmul.f32 %v713_v21, %v4213_v3 }
 0x1a8   : > { %v1564_v63 = vadd.f32 %v2025_v37, %v1563_v12  ;;  %vm1570_vm12 = vcmp.eq.f32.partialorder %v1569_v22, 8.507059e+37  ;;  %v1572_v49 = vor.u32 1.1754944e-38, %v1571_v47  ;;  %v1391_v57 = vmul.f32 %v2029_v30, %v3844_v26  ;;  %vm1567_vm13 = vmor %vm1565_vm11, %vm1566_vm10 }
 0x1a9   : > { %v2031_v15 = vpop.eup %2030  ;;  %v1193_v59 = vmul.f32 %v3874_v33, %v3834_v60  ;;  %vm1395_vm15 = vweird.f32 %v3844_v26  ;;  %v3896_v31 = vadd.f32 1e-08, %v1125_v7  ;;  %v3898_v20 = vadd.f32 1e-08, %v1310_v23  ;;  %v4214_v23 = vld [vmem:[#allocation23_spill] sm:$0xff] }
 0x1aa   : > { %v1568_v46 = vsel %vm1567_vm13, %v2025_v37, %v1564_v63  ;;  %v1392_v28 = vsub.f32 1.0, %v1391_v57  ;;  %v1399_v43 = vand.u32 2147483647, %v3844_v26  ;;  %v1575_v25 = vmul.f32 %v2031_v15, %v3849_v2 }
 0x1ab   : > { %v1573_v58 = vsel %vm1570_vm12, %v1572_v49, %v1568_v46  ;;  %vm1396_vm0 = vweird.f32 %v2029_v30  ;;  %v1401_v54 = vand.u32 2147483648, %v3844_v26  ;;  %v1583_v39 = vand.u32 2147483647, %v3849_v2 }
 0x1ac   : > { %v1620_v38 = vmul.f32 %v1573_v58, %v1481_v18  ;;  %v1393_v51 = vmul.f32 %v2029_v30, %v1392_v28  ;;  %v1576_v32 = vsub.f32 1.0, %v1575_v25  ;;  %2032 = vrcp.f32 %v3896_v31  ;;  %vm1397_vm2 = vmor %vm1395_vm15, %vm1396_vm0 }
 0x1ad   : > { %v1194_v24 = vsub.f32 1.0, %v1193_v59  ;;  %v1585_v17 = vand.u32 2147483648, %v3849_v2  ;;  %2034 = vrcp.f32 %v3898_v20  ;;  %v1494_v9 = vmul.f32 %v713_v21, %v3105_v62 }
 0x1ae   : > { %v1628_v14 = vsub.f32 1.0, %v1620_v38  ;;  %v1394_v42 = vadd.f32 %v2029_v30, %v1393_v51  ;;  %v1577_v56 = vmul.f32 %v2031_v15, %v1576_v32  ;;  %vm1580_vm1 = vweird.f32 %v2031_v15 }
 0x1af   : > { %v725_v48 = vsel %vm723_vm7, %v724_v6, %v722_v40  ;;  %v1191_v10 = vsel %vm3881_vm9, %v1190_v8, %v1186_v50  ;;  %v1402_v34 = vor.u32 1.1754944e-38, %v1401_v54  ;;  %vm1579_vm3 = vweird.f32 %v3849_v2 }
 0x1b0   : > { %v1635_v37 = vadd.f32 %v3846_v27, %v1628_v14  ;;  %v1398_v11 = vsel %vm1397_vm2, %v2029_v30, %v1394_v42  ;;  %vm1400_vm4 = vcmp.eq.f32.partialorder %v1399_v43, 8.507059e+37  ;;  %v1578_v52 = vadd.f32 %v2031_v15, %v1577_v56  ;;  %vm1581_vm5 = vmor %vm1579_vm3, %vm1580_vm1 }
 0x1b1   : > { %v3917_v44 = vmul.f32 %v1191_v10, %v1111_v55  ;;  %v1403_v53 = vsel %vm1400_vm4, %v1402_v34, %v1398_v11  ;;  %v1586_v41 = vor.u32 1.1754944e-38, %v1585_v17  ;;  %v3919_v5 = vadd.f32 1e-08, %v1494_v9 }
 0x1b2   : > { %v3921_v1 = vpop.eup %2032  ;;  %v1195_v26 = vmul.f32 %v3874_v33, %v1194_v24  ;;  %v1437_v0 = vmul.f32 %v1403_v53, %v1299_v13  ;;  %v1582_v16 = vsel %vm1581_vm5, %v2031_v15, %v1578_v52  ;;  %vm1584_vm6 = vcmp.eq.f32.partialorder %v1583_v39, 8.507059e+37  ;;  %v1301_v39 = vpop.xlane.xlu1 %1300 }
 0x1b3   : > { %v2035_v2 = vpop.eup %2034  ;;  %vm1197_vm7 = vweird.f32 %v3834_v60  ;;  %v1587_v27 = vsel %vm1584_vm6, %v1586_v41, %v1582_v16  ;;  %2036 = vrcp.f32 %v3919_v5  ;;  %v1126_v21 = vmul.f32 %v3105_v62, %v4213_v3  ;;  %v3981_v13 = vpop.xlane.xlu0 %1114 }
 0x1b4   : > { %v1201_v19 = vand.u32 2147483647, %v3834_v60  ;;  %v1445_v22 = vsub.f32 1.0, %v1437_v0  ;;  %v1621_v47 = vmul.f32 %v1587_v27, %v1483_v35  ;;  %v1405_v40 = vmul.f32 %v2035_v2, %v3898_v20  ;;  %v1485_v35 = vpop.xlane.xlu2 %1484 }
 0x1b5   : > { %v1259_v6 = vsub.f32 1.0, %v3917_v44  ;;  %vm1198_vm8 = vweird.f32 %v3874_v33  ;;  %v1203_v36 = vand.u32 2147483648, %v3834_v60  ;;  %v1207_v12 = vmul.f32 %v3921_v1, %v3896_v31 }
 0x1b6   : > { %v1196_v7 = vadd.f32 %v3874_v33, %v1195_v26  ;;  %v1452_v62 = vadd.f32 %v3872_v45, %v1445_v22  ;;  %v1629_v30 = vsub.f32 1.0, %v1621_v47  ;;  %v1406_v50 = vsub.f32 1.0, %v1405_v40  ;;  %vm3954_vm11 = vmor %vm1197_vm7, %vm1198_vm8 }
 0x1b7   : > { %v1413_v8 = vand.u32 2147483647, %v3898_v20  ;;  %v1415_v18 = vand.u32 2147483648, %v3898_v20  ;;  %v3939_v3 = vadd.f32 1e-08, %v1126_v21  ;;  %v1311_v63 = vmul.f32 %v725_v48, %v4214_v23 }
 0x1b8   : > { %v3942_v49 = vadd.f32 %v1635_v37, %v1629_v30  ;;  %v1407_v57 = vmul.f32 %v2035_v2, %v1406_v50  ;;  %vm1410_vm9 = vweird.f32 %v2035_v2  ;;  %v1495_v15 = vmul.f32 %v725_v48, %v3095_v29 }
 0x1b9   : > { %v2037_v59 = vpop.eup %2036  ;;  %vm3945_vm10 = vcmp.eq.f32.partialorder %v1201_v19, 8.507059e+37  ;;  %v1204_v45 = vor.u32 1.1754944e-38, %v1203_v36  ;;  %v1208_v28 = vsub.f32 1.0, %v1207_v12  ;;  %2038 = vrcp.f32 %v3939_v3 }
 0x1ba   : > { %v1408_v25 = vadd.f32 %v2035_v2, %v1407_v57  ;;  %vm1409_vm12 = vweird.f32 %v3898_v20  ;;  %v1589_v55 = vmul.f32 %v2037_v59, %v3919_v5  ;;  %v1127_v58 = vmul.f32 %v3095_v29, %v4214_v23 }
 0x1bb   : > { %v1200_v54 = vsel %vm3954_vm11, %v3874_v33, %v1196_v7  ;;  %vm1411_vm13 = vmor %vm1409_vm12, %vm1410_vm9  ;;  %vm1414_vm15 = vcmp.eq.f32.partialorder %v1413_v8, 8.507059e+37  ;;  %v1416_v60 = vor.u32 1.1754944e-38, %v1415_v18  ;;  %v3965_v38 = vadd.f32 1e-08, %v1311_v63 }
 0x1bc   : > { %v1412_v51 = vsel %vm1411_vm13, %v2035_v2, %v1408_v25  ;;  %v1590_v32 = vsub.f32 1.0, %v1589_v55  ;;  %v1597_v24 = vand.u32 2147483647, %v3919_v5  ;;  %v3968_v20 = vadd.f32 1e-08, %v1495_v15 }
 0x1bd   : > { %v1209_v17 = vmul.f32 %v3921_v1, %v1208_v28  ;;  %v1417_v9 = vsel %vm1414_vm15, %v1416_v60, %v1412_v51  ;;  %v1599_v29 = vand.u32 2147483648, %v3919_v5  ;;  %2040 = vrcp.f32 %v3965_v38  ;;  %v1303_v60 = vpop.xlane.xlu1 %1302  ;;  %v1095_v25 = vld [vmem:[#allocation4] sm:$0x1] }
 0x1be   : > { %v1205_v33 = vsel %vm3945_vm10, %v1204_v45, %v1200_v54  ;;  %v1438_v14 = vmul.f32 %v1417_v9, %v1301_v39  ;;  %v1591_v42 = vmul.f32 %v2037_v59, %v1590_v32  ;;  %vm1594_vm0 = vweird.f32 %v2037_v59  ;;  %v1117_v45 = vpop.xlane.xlu0 %1116 }
 0x1bf   : > { %v3975_v56 = vpop.eup %2038  ;;  %v3977_v48 = vmul.f32 %v1205_v33, %v1113_v4  ;;  %v1215_v10 = vand.u32 2147483647, %v3896_v31  ;;  %v1217_v34 = vand.u32 2147483648, %v3896_v31  ;;  %2042 = vrcp.f32 %v3968_v20 }
 0x1c0   : > { %v1446_v37 = vsub.f32 1.0, %v1438_v14  ;;  %v1592_v11 = vadd.f32 %v2037_v59, %v1591_v42  ;;  %vm1593_vm1 = vweird.f32 %v3919_v5  ;;  %v1221_v52 = vmul.f32 %v3975_v56, %v3939_v3 }
 0x1c1   : > { %v1210_v53 = vadd.f32 %v3921_v1, %v1209_v17  ;;  %vm1212_vm2 = vweird.f32 %v3921_v1  ;;  %vm1595_vm3 = vmor %vm1593_vm1, %vm1594_vm0  ;;  %vm1598_vm4 = vcmp.eq.f32.partialorder %v1597_v24, 8.507059e+37  ;;  %v1600_v41 = vor.u32 1.1754944e-38, %v1599_v29  ;;  %v1487_v29 = vpop.xlane.xlu2 %1486 }
 0x1c2   : > { %v3989_v26 = vadd.f32 %v1452_v62, %v1446_v37  ;;  %v1596_v0 = vsel %vm1595_vm3, %v2037_v59, %v1592_v11  ;;  %v1222_v16 = vsub.f32 1.0, %v1221_v52  ;;  %v3991_v2 = vadd.f32 1e-08, %v1127_v58 }
 0x1c3   : > { %v2041_v27 = vpop.eup %2040  ;;  %vm1211_vm5 = vweird.f32 %v3896_v31  ;;  %vm3994_vm6 = vcmp.eq.f32.partialorder %v1215_v10, 8.507059e+37  ;;  %v1218_v21 = vor.u32 1.1754944e-38, %v1217_v34  ;;  %v1601_v19 = vsel %vm1598_vm4, %v1600_v41, %v1596_v0 }
 0x1c4   : > { %v1260_v22 = vsub.f32 1.0, %v3977_v48  ;;  %v1622_v47 = vmul.f32 %v1601_v19, %v1485_v35  ;;  %v1223_v40 = vmul.f32 %v3975_v56, %v1222_v16  ;;  %v1419_v36 = vmul.f32 %v2041_v27, %v3965_v38  ;;  %vm4003_vm7 = vmor %vm1211_vm5, %vm1212_vm2 }
 0x1c5   : > { %v2043_v4 = vpop.eup %2042  ;;  %vm1225_vm8 = vweird.f32 %v3939_v3  ;;  %v1229_v31 = vand.u32 2147483647, %v3939_v3  ;;  %v1231_v7 = vand.u32 2147483648, %v3939_v3  ;;  %2044 = vrcp.f32 %v3991_v2 }
 0x1c6   : > { %v1214_v62 = vsel %vm4003_vm7, %v3921_v1, %v1210_v53  ;;  %v1630_v30 = vsub.f32 1.0, %v1622_v47  ;;  %v1420_v50 = vsub.f32 1.0, %v1419_v36  ;;  %v1603_v8 = vmul.f32 %v2043_v4, %v3968_v20 }
 0x1c7   : > { %v1224_v18 = vadd.f32 %v3975_v56, %v1223_v40  ;;  %vm1226_vm9 = vweird.f32 %v3975_v56  ;;  %v1427_v23 = vand.u32 2147483647, %v3965_v38  ;;  %v1429_v63 = vand.u32 2147483648, %v3965_v38 }
 0x1c8   : > { %v1637_v57 = vadd.f32 %v3942_v49, %v1630_v30  ;;  %v1421_v15 = vmul.f32 %v2041_v27, %v1420_v50  ;;  %vm1424_vm10 = vweird.f32 %v2041_v27  ;;  %v1604_v59 = vsub.f32 1.0, %v1603_v8  ;;  %vm4030_vm12 = vmor %vm1225_vm8, %vm1226_vm9 }
 0x1c9   : > { %v1219_v1 = vsel %vm3994_vm6, %v1218_v21, %v1214_v62  ;;  %vm4022_vm11 = vcmp.eq.f32.partialorder %v1229_v31, 8.507059e+37  ;;  %v1611_v28 = vand.u32 2147483647, %v3968_v20  ;;  %v1613_v43 = vand.u32 2147483648, %v3968_v20  ;;  %v1119_v21 = vpop.xlane.xlu0 %1118 }
 0x1ca   : > { %v1422_v49 = vadd.f32 %v2041_v27, %v1421_v15  ;;  %vm1423_vm13 = vweird.f32 %v3965_v38  ;;  %v1605_v55 = vmul.f32 %v2043_v4, %v1604_v59  ;;  %vm1608_vm15 = vweird.f32 %v2043_v4  ;;  %v1463_v15 = vld [vmem:[#allocation6] sm:$0x1] }
 0x1cb   : > { %v2045_v58 = vpop.eup %2044  ;;  %v1228_v54 = vsel %vm4030_vm12, %v3975_v56, %v1224_v18  ;;  %v1232_v39 = vor.u32 1.1754944e-38, %v1231_v7  ;;  %vm1425_vm0 = vmor %vm1423_vm13, %vm1424_vm10  ;;  %vm1428_vm1 = vcmp.eq.f32.partialorder %v1427_v23, 8.507059e+37  ;;  %v1430_v3 = vor.u32 1.1754944e-38, %v1429_v63  ;;  %v1279_v18 = vld [vmem:[#allocation5] sm:$0x1] }
 0x1cc   : > { %v1426_v51 = vsel %vm1425_vm0, %v2041_v27, %v1422_v49  ;;  %v1606_v32 = vadd.f32 %v2043_v4, %v1605_v55  ;;  %vm1607_vm2 = vweird.f32 %v3968_v20  ;;  %v1235_v24 = vmul.f32 %v2045_v58, %v3991_v2 }
 0x1cd   : > { %v1253_v38 = vmul.f32 %v1219_v1, %v3981_v13  ;;  %v1431_v17 = vsel %vm1428_vm1, %v1430_v3, %v1426_v51  ;;  %vm1609_vm3 = vmor %vm1607_vm2, %vm1608_vm15  ;;  %vm1612_vm4 = vcmp.eq.f32.partialorder %v1611_v28, 8.507059e+37  ;;  %v1614_v9 = vor.u32 1.1754944e-38, %v1613_v43 }
 0x1ce   : > { %v1233_v33 = vsel %vm4022_vm11, %v1232_v39, %v1228_v54  ;;  %v1439_v14 = vmul.f32 %v1431_v17, %v1303_v60  ;;  %v1610_v42 = vsel %vm1609_vm3, %v2043_v4, %v1606_v32  ;;  %v1236_v56 = vsub.f32 1.0, %v1235_v24 }
 0x1cf   : > { %v1254_v10 = vmul.f32 %v1233_v33, %v1117_v45  ;;  %v1615_v34 = vsel %vm1612_vm4, %v1614_v9, %v1610_v42  ;;  %v1243_v37 = vand.u32 2147483647, %v3991_v2  ;;  %v1245_v20 = vand.u32 2147483648, %v3991_v2 }
 0x1d0   : > { %v1447_v11 = vsub.f32 1.0, %v1439_v14  ;;  %v1623_v52 = vmul.f32 %v1615_v34, %v1487_v29  ;;  %v1237_v13 = vmul.f32 %v2045_v58, %v1236_v56  ;;  %vm1240_vm5 = vweird.f32 %v2045_v58 }
 0x1d1   : > { %v1266_v53 = vadd.f32 %v3817_v61, %v1259_v6  ;;  %v1261_v35 = vsub.f32 1.0, %v1253_v38  ;;  %vm1239_vm6 = vweird.f32 %v3991_v2  ;;  %vm1244_vm8 = vcmp.eq.f32.partialorder %v1243_v37, 8.507059e+37 }
 0x1d2   : > { %v1454_v41 = vadd.f32 %v3989_v26, %v1447_v11  ;;  %v1631_v0 = vsub.f32 1.0, %v1623_v52  ;;  %v1238_v16 = vadd.f32 %v2045_v58, %v1237_v13  ;;  %vm1241_vm7 = vmor %vm1239_vm6, %vm1240_vm5  ;;  %v1246_v5 = vor.u32 1.1754944e-38, %v1245_v20 }
 0x1d3   : > { %v1267_v27 = vadd.f32 %v1266_v53, %v1260_v22  ;;  %v1262_v19 = vsub.f32 1.0, %v1254_v10 }
 0x1d4   : > { %v1455_v47 = vrot.slane %v1454_v41, 4  ;;  %v1638_v40 = vadd.f32 %v1637_v57, %v1631_v0  ;;  %v1242_v44 = vsel %vm1241_vm7, %v2045_v58, %v1238_v16 }
 0x1d5   : > { %v1247_v36 = vsel %vm1244_vm8, %v1246_v5, %v1242_v44  ;;  %v1268_v61 = vadd.f32 %v1267_v27, %v1261_v35 }
 0x1d6   : > { %v1456_v6 = vadd.f32 %v1455_v47, %v1454_v41  ;;  %v1639_v4 = vrot.slane %v1638_v40, 4  ;;  %v1255_v26 = vmul.f32 %v1247_v36, %v1119_v21 }
 0x1d7   : > { %v1269_v12 = vadd.f32 %v1268_v61, %v1262_v19 }
 0x1d8   : > { %v1457_v31 = vrot.slane %v1456_v6, 2  ;;  %v1640_v7 = vadd.f32 %v1639_v4, %v1638_v40  ;;  %v1263_v2 = vsub.f32 1.0, %v1255_v26 }
 0x1da   : > { %v1458_v62 = vadd.f32 %v1457_v31, %v1456_v6  ;;  %v1641_v48 = vrot.slane %v1640_v7, 2  ;;  %v1270_v22 = vadd.f32 %v1269_v12, %v1263_v2 }
 0x1dc   : > { %v1459_v30 = vrot.slane %v1458_v62, 1  ;;  %v1642_v50 = vadd.f32 %v1641_v48, %v1640_v7  ;;  %v1271_v8 = vrot.slane %v1270_v22, 4 }
 0x1de   : > { %v1460_v23 = vadd.f32 %v1459_v30, %v1458_v62  ;;  %v1643_v63 = vrot.slane %v1642_v50, 1  ;;  %v1272_v57 = vadd.f32 %v1271_v8, %v1270_v22 }
 0x1e0   : > { %v1461_v59 = vadd.f32 %v1460_v23, %v1279_v18  ;;  %v1644_v1 = vadd.f32 %v1643_v63, %v1642_v50  ;;  %v1273_v46 = vrot.slane %v1272_v57, 2 }
 0x1e2   : > { %1462 = vst.msk [vmem:[#allocation5] sm:$0x1] %vm909_vm14, %v1461_v59  ;;  %v1645_v45 = vadd.f32 %v1644_v1, %v1463_v15  ;;  %v1274_v28 = vadd.f32 %v1273_v46, %v1272_v57 }
 0x1e4   : > { %1646 = vst.msk [vmem:[#allocation6] sm:$0x1] %vm909_vm14, %v1645_v45  ;;  %v1275_v43 = vrot.slane %v1274_v28, 1 }
 0x1e6   : > { %v1276_v49 = vadd.f32 %v1275_v43, %v1274_v28  ;;  %1650 = sbr.rel (%p1824_p12) target bundleno = 521 (0x209), region = 36 }
 0x1e8   : > { %v1277_v55 = vadd.f32 %v1276_v49, %v1095_v25 }
 0x1ea   : > { %1278 = vst.msk [vmem:[#allocation4] sm:$0x1] %vm909_vm14, %v1277_v55 }
 0x1eb   : > { %v1651_v58 = vld [vmem:[#allocation2] sm:$0x1]  ;;  %v1652_v54 = vld [vmem:[#allocation3] sm:$0x1]  ;;  %v1658_v60 = vld [vmem:[#allocation5] sm:$0x1] }
 0x1ec   : > { %v1653_v39 = vadd.f32 %v1652_v54, %v1651_v58  ;;  %v1659_v3 = vld [vmem:[#allocation6] sm:$0x1] }
 0x1ed   : > { %v1660_v51 = vadd.f32 %v1659_v3, %v1658_v60 }
 0x1ee   : > { %v1654_v32 = vmul.f32 0.00390625, %v1653_v39 }
 0x1ef   : > { %v1661_v24 = vmul.f32 0.00390625, %v1660_v51 }
 0x1f0   : > { %1681 = vst.msk [vmem:[#allocation11] sm:$0x1] %vm909_vm14, %v1654_v32  ;;  %v1678_v52 = vmul.f32 0.1, %v1654_v32 }
 0x1f1   : > { %v1662_v38 = vadd.f32 1e-05, %v1661_v24  ;;  %v1655_v17 = vld [vmem:[#allocation4] sm:$0x1] }
 0x1f2   : > { %v1656_v33 = vmul.f32 3.90625e-05, %v1655_v17 }
 0x1f3   : > { %2046 = vrcp.f32 %v1662_v38  ;;  %1682 = vst.msk [vmem:[#allocation13] sm:$0x1] %vm909_vm14, %v1662_v38  ;;  %v1674_v14 = vand.u32 2147483648, %v1662_v38  ;;  %vm1668_vm9 = vweird.f32 %v1662_v38  ;;  %v1672_v56 = vand.u32 2147483647, %v1662_v38 }
 0x1f4   : > { %v1657_v37 = vadd.f32 %v1656_v33, %v1654_v32 }
 0x1f5   : > { %v1675_v34 = vor.u32 1.1754944e-38, %v1674_v14  ;;  %vm1673_vm12 = vcmp.eq.f32.partialorder %v1672_v56, 8.507059e+37 }
 0x1f9   : > { %v2047_v9 = vpop.eup %2046 }
 0x1fa   : > { %v1664_v29 = vmul.f32 %v2047_v9, %v1662_v38  ;;  %vm1669_vm10 = vweird.f32 %v2047_v9 }
 0x1fb   : > { %vm1670_vm11 = vmor %vm1668_vm9, %vm1669_vm10 }
 0x1fc   : > { %v1665_v42 = vsub.f32 1.0, %v1664_v29 }
 0x1fe   : > { %v1666_v10 = vmul.f32 %v2047_v9, %v1665_v42 }
 0x200   : > { %v1667_v20 = vadd.f32 %v2047_v9, %v1666_v10 }
 0x202   : > { %v1671_v11 = vsel %vm1670_vm11, %v2047_v9, %v1667_v20 }
 0x203   : > { %v1676_v13 = vsel %vm1673_vm12, %v1675_v34, %v1671_v11 }
 0x204   : > { %v1677_v53 = vmul.f32 %v1676_v13, %v1657_v37 }
 0x206   : > { %v1679_v35 = vadd.f32 %v1678_v52, %v1677_v53 }
 0x208   : > { %1680 = vst.msk [vmem:[#allocation10] sm:$0x1] %vm909_vm14, %v1679_v35 }
 0x209 PF: > { %p1855_p13 = scmp.eq.s32.totalorder %s2224_s16, 3  ;;  %s2182_s15 = smov [#allocation11]  }
 0x20a   : > { %s1701_s21 = sshll.u32 %s2182_s15, 4  ;;  %s1703_s28 = sshll.u32 %s4099_s2, 4  ;;  %s1702_s21 = int_to_ptr.vmem [resolvable:$true] %s1701_s21  ;;  %s1704_s28 = int_to_ptr.hbm [resolvable:$true] %s1703_s28 }
 0x20b   : > { %1846 = dma.vmem_to_hbm [thread:$0]  (%p1855_p13), %s1702_s21, 16, %s1704_s28, [#allocation12]  }
 0x20c   : > { %s1691_s4 = sshll.u32 %s4098_s1, 4  ;;  %s2183_s5 = smov [#allocation10]   ;;  %s1692_s4 = int_to_ptr.hbm [resolvable:$true] %s1691_s4 }
 0x20d   : > { %s1689_s6 = sshll.u32 %s2183_s5, 4  ;;  %s2184_s7 = smov [#allocation13]   ;;  %s1690_s6 = int_to_ptr.vmem [resolvable:$true] %s1689_s6 }
 0x20e   : > { %1844 = dma.vmem_to_hbm [thread:$0]  (%p1855_p13), %s1690_s6, 16, %s1692_s4, [#allocation9]  }
 0x20f   : > { %s1713_s8 = sshll.u32 %s2184_s7, 4  ;;  %s1715_s11 = sshll.u32 %s4100_s3, 4  ;;  %s1714_s8 = int_to_ptr.vmem [resolvable:$true] %s1713_s8  ;;  %s1716_s11 = int_to_ptr.hbm [resolvable:$true] %s1715_s11 }
 0x210   : > { %1848 = dma.vmem_to_hbm [thread:$0]  (%p1855_p13), %s1714_s8, 16, %s1716_s11, [#allocation12]  }
 0x211   : > { %2153 = dma.done.wait (%p1855_p13), [#allocation9], 16  }
 0x212   : > { %2155 = vsyncadd (%p1855_p13), [#allocation9], 4294967280 }
 0x213   : > { %2157 = dma.done.wait (%p1855_p13), [#allocation12], 32  }
 0x214   : > { %2159 = vsyncadd (%p1855_p13), [#allocation12], 4294967264 }
 0x215 PF: > { %p16_p0 = scmp.ge.s32.totalorder %s2227_s17, 6   ;;  %s4227_s12 = smov %s2166_s13 }
 0x216   : > { %s4228_s13 = smov %s2170_s14  ;;  %s4229_s14 = smov %s2237_s20 }
 0x217   : > { %s4230_s15 = smov %s2227_s17  ;;  %18 = sbr.rel (!%p16_p0) target bundleno = 5 (0x5), region = 93 }
 0x21c   :  { %1739 = vsyncpa [#allocation8], 1 }
 0x21d   :  { %1741 = vsyncpa [#allocation8 + $0x1], 1 }
 0x21e   :  { %1742 = vsyncpa [#allocation9], 1 }
 0x21f   :  { %1744 = vsyncpa [#allocation9 + $0x1], 1 }
 0x220   :  { %1745 = vsyncpa [#allocation12], 1 }

</bundles_post_ra>
